<compile_context>
chip_gen: v7x
topology: tpu7x:2x2x1
jax: 0.10.0
libtpu: 0.0.40
codegen_flags: <defaults>
</compile_context>

<pallas_src>
import functools
import math

import jax
import jax.numpy as jnp
from jax import lax
from jax.experimental import pallas as pl
from jax.experimental.pallas import tpu as pltpu


def mhca_kernel(vis_ref, inf_ref,
                w_vis_ref, b_vis_ref, w_inf_ref, b_inf_ref,
                wo_vis_ref, bo_vis_ref, wo_inf_ref, bo_inf_ref,
                o_vis_ref, o_inf_ref, *scratch,
                num_heads, head_dim, block_b, seq_len, fused_out):
    f32 = jnp.float32
    D = num_heads * head_dim
    S = seq_len
    M = block_b * S
    cdt = vis_ref.dtype  # MXU compute dtype (native I/O dtype, no upcast)

    # Grid-invariant weights: native dtype, single-buffered (see const_spec()).
    w_vis = w_vis_ref[...]                       # (D, 3D)  x @ W layout, Q pre-scaled
    w_inf = w_inf_ref[...]                       # (D, 3D)
    wo_vis = wo_vis_ref[...]                     # (D, D)
    wo_inf = wo_inf_ref[...]                     # (D, D)
    b_vis = b_vis_ref[...].astype(f32)           # (1, 3D)  tiny, add in f32
    b_inf = b_inf_ref[...].astype(f32)
    bo_vis = bo_vis_ref[...].astype(f32)         # (1, D)
    bo_inf = bo_inf_ref[...].astype(f32)

    if fused_out:
        ctx_vis_ref, ctx_inf_ref = scratch       # (M, D) f32 head-major ctx scratch

    # Whole block folded into the matmul M dimension: one fused QKV matmul per
    # stream per grid step (bigger M fills the MXU, weights streamed once).
    vis = vis_ref[...].reshape(M, D)
    inf = inf_ref[...].reshape(M, D)
    proj_vis = (jnp.dot(vis, w_vis, preferred_element_type=f32) + b_vis).astype(cdt)
    proj_inf = (jnp.dot(inf, w_inf, preferred_element_type=f32) + b_inf).astype(cdt)

    q_vis, k_vis, v_vis = proj_vis[:, :D], proj_vis[:, D:2 * D], proj_vis[:, 2 * D:]
    q_inf, k_inf, v_inf = proj_inf[:, :D], proj_inf[:, D:2 * D], proj_inf[:, 2 * D:]

    contract_last = (((1,), (1,)), ((), ()))     # q @ k.T without explicit transpose

    # TODO(synk): for very large num_heads*block_b convert these static loops to
    # lax.fori_loop to bound live ranges / vreg pressure.
    for bb in range(block_b):
        r = slice(bb * S, (bb + 1) * S)

        if not fused_out:
            out_vis = bo_vis                     # (1, D) broadcasts to (S, D)
            out_inf = bo_inf

        for h in range(num_heads):
            sl = slice(h * head_dim, (h + 1) * head_dim)

            # out_inf path: Q from vis, K/V from inf (scale folded into Q weights).
            s_vi = lax.dot_general(q_vis[r, sl], k_inf[r, sl], contract_last,
                                   preferred_element_type=f32)
            p_vi = jnp.exp(s_vi - jnp.max(s_vi, axis=-1, keepdims=True))
            inv_vi = pl.reciprocal(jnp.sum(p_vi, axis=-1, keepdims=True), approx=True)
            a_inf = (p_vi * inv_vi).astype(cdt)
            ctx_inf_h = jnp.dot(a_inf, v_inf[r, sl], preferred_element_type=f32)

            # out_vis path: Q from inf, K/V from vis.
            s_iv = lax.dot_general(q_inf[r, sl], k_vis[r, sl], contract_last,
                                   preferred_element_type=f32)
            p_iv = jnp.exp(s_iv - jnp.max(s_iv, axis=-1, keepdims=True))
            inv_iv = pl.reciprocal(jnp.sum(p_iv, axis=-1, keepdims=True), approx=True)
            a_vis = (p_iv * inv_iv).astype(cdt)
            ctx_vis_h = jnp.dot(a_vis, v_vis[r, sl], preferred_element_type=f32)

            if fused_out:
                # Lane-aligned head slice: stage ctx head-major in f32 scratch.
                ctx_inf_ref[r, sl] = ctx_inf_h
                ctx_vis_ref[r, sl] = ctx_vis_h
            else:
                # Fallback: accumulate out-projection per head (contraction = head_dim).
                out_inf = out_inf + jnp.dot(ctx_inf_h.astype(cdt), wo_inf[sl, :],
                                            preferred_element_type=f32)
                out_vis = out_vis + jnp.dot(ctx_vis_h.astype(cdt), wo_vis[sl, :],
                                            preferred_element_type=f32)

        if not fused_out:
            o_vis_ref[bb] = out_vis.astype(o_vis_ref.dtype)
            o_inf_ref[bb] = out_inf.astype(o_inf_ref.dtype)

    if fused_out:
        # One full-D contraction per stream: fully utilizes the MXU.
        ctx_v = ctx_vis_ref[...].astype(cdt)
        ctx_i = ctx_inf_ref[...].astype(cdt)
        out_v = jnp.dot(ctx_v, wo_vis, preferred_element_type=f32) + bo_vis
        out_i = jnp.dot(ctx_i, wo_inf, preferred_element_type=f32) + bo_inf
        o_vis_ref[...] = out_v.reshape(block_b, S, D).astype(o_vis_ref.dtype)
        o_inf_ref[...] = out_i.reshape(block_b, S, D).astype(o_inf_ref.dtype)


def _vmem_capacity_bytes():
    try:
        return int(pltpu.get_tpu_info().vmem_capacity_bytes)
    except Exception:
        return 64 * 1024 * 1024  # conservative: v7x per-TensorCore VMEM


def multi_head_cross_attention(vis, inf, params, num_heads, *, block_b=None):
    """vis, inf: (B, S, D). params hold PyTorch-layout (out, in) Linear weights."""
    B, S, D = vis.shape
    assert D % num_heads == 0, "model_dim must be divisible by num_heads"
    head_dim = D // num_heads
    scale = 1.0 / math.sqrt(head_dim)
    wdt = vis.dtype
    dsize = jnp.dtype(wdt).itemsize

    # Fused x@W-layout QKV weights; 1/sqrt(head_dim) folded into the Q columns/bias.
    w_vis_all = jnp.concatenate(
        [params["wq_vis"].T * scale, params["wk_vis"].T, params["wv_vis"].T],
        axis=1).astype(wdt)
    b_vis_all = jnp.concatenate(
        [params["bq_vis"] * scale, params["bk_vis"], params["bv_vis"]])[None, :]
    w_inf_all = jnp.concatenate(
        [params["wq_inf"].T * scale, params["wk_inf"].T, params["wv_inf"].T],
        axis=1).astype(wdt)
    b_inf_all = jnp.concatenate(
        [params["bq_inf"] * scale, params["bk_inf"], params["bv_inf"]])[None, :]
    wo_vis = params["wo_vis"].T.astype(wdt)
    bo_vis = params["bo_vis"][None, :]
    wo_inf = params["wo_inf"].T.astype(wdt)
    bo_inf = params["bo_inf"][None, :]

    fused_out = (head_dim % 128 == 0)  # lane-aligned head slices only

    # ---- VMEM budget / block_b selection -------------------------------------
    vmem_cap = _vmem_capacity_bytes()
    weight_bytes = (2 * (D * 3 * D) + 2 * D * D) * dsize + 8 * D * 4  # single-buffered

    def resident_bytes(bb):
        stream = 4 * bb * S * D * dsize * 2            # (vis,inf) x (in,out), 2 buffers
        proj = 2 * bb * S * 3 * D * (4 + dsize)        # f32 + cdt QKV temporaries
        ctx = (2 * bb * S * D * 4) if fused_out else (2 * S * D * 4)
        scores = 4 * S * S * 4                         # a few SxS f32 temps in flight
        return weight_bytes + stream + proj + ctx + scores

    if block_b is None:
        block_b = 1
        upper = max(B // 2, 1)                         # keep grid >= 2 for dual-TC v7x
        for cand in range(upper, 0, -1):
            if B % cand == 0 and resident_bytes(cand) <= vmem_cap // 2:
                block_b = cand
                break
    assert B % block_b == 0, "block_b must divide batch"

    vmem_limit = int(min(vmem_cap * 0.9,
                         max(32 * 1024 * 1024, resident_bytes(block_b) * 2)))

    kernel = functools.partial(
        mhca_kernel, num_heads=num_heads, head_dim=head_dim,
        block_b=block_b, seq_len=S, fused_out=fused_out)

    def io_spec():
        return pl.BlockSpec((block_b, S, D), lambda b: (b, 0, 0))

    def const_spec(shape):
        # Grid-invariant: single-buffer to halve weight residency in VMEM.
        return pl.BlockSpec(shape, lambda b: (0, 0), pipeline_mode=pl.Buffered(1))

    scratch_shapes = []
    if fused_out:
        scratch_shapes = [pltpu.VMEM((block_b * S, D), jnp.float32),   # ctx_vis
                          pltpu.VMEM((block_b * S, D), jnp.float32)]   # ctx_inf

    weight_args = (w_vis_all, b_vis_all, w_inf_all, b_inf_all,
                   wo_vis, bo_vis, wo_inf, bo_inf)
    flops = B * (16 * S * D * D + 8 * S * S * D)
    transcendentals = 2 * B * num_heads * S * S
    bytes_accessed = 4 * B * S * D * dsize + sum(
        int(a.size) * a.dtype.itemsize for a in weight_args)

    out_vis, out_inf = pl.pallas_call(
        kernel,
        out_shape=(jax.ShapeDtypeStruct((B, S, D), vis.dtype),
                   jax.ShapeDtypeStruct((B, S, D), inf.dtype)),
        grid_spec=pltpu.PrefetchScalarGridSpec(
            num_scalar_prefetch=0,
            grid=(B // block_b,),
            in_specs=[
                io_spec(), io_spec(),
                const_spec((D, 3 * D)), const_spec((1, 3 * D)),
                const_spec((D, 3 * D)), const_spec((1, 3 * D)),
                const_spec((D, D)), const_spec((1, D)),
                const_spec((D, D)), const_spec((1, D)),
            ],
            out_specs=[io_spec(), io_spec()],
            scratch_shapes=scratch_shapes),
        compiler_params=pltpu.CompilerParams(
            dimension_semantics=("parallel",),
            vmem_limit_bytes=vmem_limit),
        cost_estimate=pl.CostEstimate(
            flops=flops, transcendentals=transcendentals,
            bytes_accessed=bytes_accessed),
    )(vis, inf, *weight_args)
    return out_vis, out_inf


def mhca_ref(vis, inf, params, num_heads):
    """Pure-JAX reference mirroring the PyTorch module."""
    B, S, D = vis.shape
    hd = D // num_heads

    def linear(x, w, b):
        return x @ w.T + b

    def split(x):
        return x.reshape(B, S, num_heads, hd).transpose(0, 2, 1, 3)

    Qv = split(linear(vis, params["wq_vis"], params["bq_vis"]))
    Kv = split(linear(vis, params["wk_vis"], params["bk_vis"]))
    Vv = split(linear(vis, params["wv_vis"], params["bv_vis"]))
    Qi = split(linear(inf, params["wq_inf"], params["bq_inf"]))
    Ki = split(linear(inf, params["wk_inf"], params["bk_inf"]))
    Vi = split(linear(inf, params["wv_inf"], params["bv_inf"]))

    scale = 1.0 / jnp.sqrt(jnp.float32(hd))
    s_vi = jnp.einsum("bhqd,bhkd->bhqk", Qv, Ki) * scale
    s_iv = jnp.einsum("bhqd,bhkd->bhqk", Qi, Kv) * scale
    a_inf = jax.nn.softmax(s_vi, axis=-1)
    a_vis = jax.nn.softmax(s_iv, axis=-1)
    out_inf = jnp.einsum("bhqk,bhkd->bhqd", a_inf, Vi)
    out_vis = jnp.einsum("bhqk,bhkd->bhqd", a_vis, Vv)

    def merge(x):
        return x.transpose(0, 2, 1, 3).reshape(B, S, D)

    out_vis = linear(merge(out_vis), params["wo_vis"], params["bo_vis"])
    out_inf = linear(merge(out_inf), params["wo_inf"], params["bo_inf"])
    return out_vis, out_inf


def _make_params(key, D, dtype=jnp.float32):
    names = ["q_vis", "k_vis", "v_vis", "q_inf", "k_inf", "v_inf", "o_vis", "o_inf"]
    params = {}
    keys = jax.random.split(key, 2 * len(names))
    w_scale = D ** -0.5
    for i, n in enumerate(names):
        # PyTorch nn.Linear layout: weight (out, in), bias (out,)
        params["w" + n] = jax.random.normal(keys[2 * i], (D, D), dtype=dtype) * w_scale
        params["b" + n] = jax.random.normal(keys[2 * i + 1], (D,), dtype=dtype) * 0.1
    return params


def _run_case(key, B, S, D, H):
    k1, k2, k3 = jax.random.split(key, 3)
    vis = jax.random.normal(k1, (B, S, D), dtype=jnp.float32)
    inf = jax.random.normal(k2, (B, S, D), dtype=jnp.float32)
    params = _make_params(k3, D)

    out_vis, out_inf = multi_head_cross_attention(vis, inf, params, H)
    out_vis, out_inf = jax.block_until_ready((out_vis, out_inf))

    ref_vis, ref_inf = mhca_ref(vis, inf, params, H)
    assert out_vis.shape == (B, S, D) and out_inf.shape == (B, S, D)
    # approx-reciprocal softmax -> slightly looser tolerance than pure f32.
    assert jnp.allclose(out_vis, ref_vis, atol=1e-2, rtol=1e-2), \
        f"out_vis mismatch (B={B},S={S},D={D},H={H})"
    assert jnp.allclose(out_inf, ref_inf, atol=1e-2, rtol=1e-2), \
        f"out_inf mismatch (B={B},S={S},D={D},H={H})"


if __name__ == "__main__":
    key = jax.random.PRNGKey(0)
    k1, k2 = jax.random.split(key)
    # Case 1: head_dim = 8  -> per-head out-projection fallback path.
    _run_case(k1, B=2, S=8, D=32, H=4)
    # Case 2: head_dim = 128 -> lane-aligned fused single out-projection path.
    _run_case(k2, B=2, S=8, D=256, H=2)
    print("KERNEL_OK")
</pallas_src>

<mosaic_0001>
module attributes {stable_mosaic.version = 11 : i64} {
  func.func @mhca_kernel(%arg0: i32, %arg1: memref<1x8x32xf32, #tpu.memory_space<vmem>>, %arg2: memref<1x8x32xf32, #tpu.memory_space<vmem>>, %arg3: memref<32x96xf32, #tpu.memory_space<vmem>>, %arg4: memref<1x96xf32, #tpu.memory_space<vmem>>, %arg5: memref<32x96xf32, #tpu.memory_space<vmem>>, %arg6: memref<1x96xf32, #tpu.memory_space<vmem>>, %arg7: memref<32x32xf32, #tpu.memory_space<vmem>>, %arg8: memref<1x32xf32, #tpu.memory_space<vmem>>, %arg9: memref<32x32xf32, #tpu.memory_space<vmem>>, %arg10: memref<1x32xf32, #tpu.memory_space<vmem>>, %arg11: memref<1x8x32xf32, #tpu.memory_space<vmem>>, %arg12: memref<1x8x32xf32, #tpu.memory_space<vmem>>) attributes {dimension_semantics = [#tpu.dimension_semantics<parallel>], iteration_bounds = array<i64: 2>, scalar_prefetch = 0 : i64, scratch_operands = 0 : i64, tpu.core_type = #tpu.core_type<tc>, window_params = [{transform_indices = @transform_0, window_bounds = array<i64: 1, 8, 32>}, {transform_indices = @transform_1, window_bounds = array<i64: 1, 8, 32>}, {pipeline_mode = #tpu.pipeline_mode<synchronous>, transform_indices = @transform_2, window_bounds = array<i64: 32, 96>}, {pipeline_mode = #tpu.pipeline_mode<synchronous>, transform_indices = @transform_3, window_bounds = array<i64: 1, 96>}, {pipeline_mode = #tpu.pipeline_mode<synchronous>, transform_indices = @transform_4, window_bounds = array<i64: 32, 96>}, {pipeline_mode = #tpu.pipeline_mode<synchronous>, transform_indices = @transform_5, window_bounds = array<i64: 1, 96>}, {pipeline_mode = #tpu.pipeline_mode<synchronous>, transform_indices = @transform_6, window_bounds = array<i64: 32, 32>}, {pipeline_mode = #tpu.pipeline_mode<synchronous>, transform_indices = @transform_7, window_bounds = array<i64: 1, 32>}, {pipeline_mode = #tpu.pipeline_mode<synchronous>, transform_indices = @transform_8, window_bounds = array<i64: 32, 32>}, {pipeline_mode = #tpu.pipeline_mode<synchronous>, transform_indices = @transform_9, window_bounds = array<i64: 1, 32>}, {transform_indices = @transform_10, window_bounds = array<i64: 1, 8, 32>}, {transform_indices = @transform_11, window_bounds = array<i64: 1, 8, 32>}]} {
    %c0 = arith.constant 0 : index
    %c0_0 = arith.constant 0 : index
    %0 = vector.load %arg3[%c0, %c0_0] : memref<32x96xf32, #tpu.memory_space<vmem>>, vector<32x96xf32>
    %c0_1 = arith.constant 0 : index
    %c0_2 = arith.constant 0 : index
    %1 = vector.load %arg5[%c0_1, %c0_2] : memref<32x96xf32, #tpu.memory_space<vmem>>, vector<32x96xf32>
    %c0_3 = arith.constant 0 : index
    %c0_4 = arith.constant 0 : index
    %2 = vector.load %arg7[%c0_3, %c0_4] : memref<32x32xf32, #tpu.memory_space<vmem>>, vector<32x32xf32>
    %c0_5 = arith.constant 0 : index
    %c0_6 = arith.constant 0 : index
    %3 = vector.load %arg9[%c0_5, %c0_6] : memref<32x32xf32, #tpu.memory_space<vmem>>, vector<32x32xf32>
    %c0_7 = arith.constant 0 : index
    %c0_8 = arith.constant 0 : index
    %4 = vector.load %arg4[%c0_7, %c0_8] : memref<1x96xf32, #tpu.memory_space<vmem>>, vector<1x96xf32>
    %c0_9 = arith.constant 0 : index
    %c0_10 = arith.constant 0 : index
    %5 = vector.load %arg6[%c0_9, %c0_10] : memref<1x96xf32, #tpu.memory_space<vmem>>, vector<1x96xf32>
    %c0_11 = arith.constant 0 : index
    %c0_12 = arith.constant 0 : index
    %6 = vector.load %arg8[%c0_11, %c0_12] : memref<1x32xf32, #tpu.memory_space<vmem>>, vector<1x32xf32>
    %c0_13 = arith.constant 0 : index
    %c0_14 = arith.constant 0 : index
    %7 = vector.load %arg10[%c0_13, %c0_14] : memref<1x32xf32, #tpu.memory_space<vmem>>, vector<1x32xf32>
    %c0_15 = arith.constant 0 : index
    %c0_16 = arith.constant 0 : index
    %c0_17 = arith.constant 0 : index
    %8 = vector.load %arg1[%c0_15, %c0_16, %c0_17] : memref<1x8x32xf32, #tpu.memory_space<vmem>>, vector<1x8x32xf32>
    %9 = vector.shape_cast %8 : vector<1x8x32xf32> to vector<8x32xf32>
    %c0_18 = arith.constant 0 : index
    %c0_19 = arith.constant 0 : index
    %c0_20 = arith.constant 0 : index
    %10 = vector.load %arg2[%c0_18, %c0_19, %c0_20] : memref<1x8x32xf32, #tpu.memory_space<vmem>>, vector<1x8x32xf32>
    %11 = vector.shape_cast %10 : vector<1x8x32xf32> to vector<8x32xf32>
    %cst = arith.constant dense<0.000000e+00> : vector<8x96xf32>
    %12 = tpu.matmul %9, %0, %cst {dimension_numbers = #tpu.dot_dimension_numbers<[1], [0], [0], [1], [0, 0, 1, 1], [], []>} : vector<8x32xf32>, vector<32x96xf32>, vector<8x96xf32> -> vector<8x96xf32>
    %13 = vector.broadcast %4 : vector<1x96xf32> to vector<8x96xf32>
    %14 = arith.addf %12, %13 : vector<8x96xf32>
    %cst_21 = arith.constant dense<0.000000e+00> : vector<8x96xf32>
    %15 = tpu.matmul %11, %1, %cst_21 {dimension_numbers = #tpu.dot_dimension_numbers<[1], [0], [0], [1], [0, 0, 1, 1], [], []>} : vector<8x32xf32>, vector<32x96xf32>, vector<8x96xf32> -> vector<8x96xf32>
    %16 = vector.broadcast %5 : vector<1x96xf32> to vector<8x96xf32>
    %17 = arith.addf %15, %16 : vector<8x96xf32>
    %18 = vector.extract_strided_slice %14 {offsets = [0, 0], sizes = [8, 32], strides = [1, 1]} : vector<8x96xf32> to vector<8x32xf32>
    %19 = vector.extract_strided_slice %14 {offsets = [0, 32], sizes = [8, 32], strides = [1, 1]} : vector<8x96xf32> to vector<8x32xf32>
    %20 = vector.extract_strided_slice %14 {offsets = [0, 64], sizes = [8, 32], strides = [1, 1]} : vector<8x96xf32> to vector<8x32xf32>
    %21 = vector.extract_strided_slice %17 {offsets = [0, 0], sizes = [8, 32], strides = [1, 1]} : vector<8x96xf32> to vector<8x32xf32>
    %22 = vector.extract_strided_slice %17 {offsets = [0, 32], sizes = [8, 32], strides = [1, 1]} : vector<8x96xf32> to vector<8x32xf32>
    %23 = vector.extract_strided_slice %17 {offsets = [0, 64], sizes = [8, 32], strides = [1, 1]} : vector<8x96xf32> to vector<8x32xf32>
    %24 = vector.extract_strided_slice %18 {offsets = [0, 0], sizes = [8, 8], strides = [1, 1]} : vector<8x32xf32> to vector<8x8xf32>
    %25 = vector.extract_strided_slice %22 {offsets = [0, 0], sizes = [8, 8], strides = [1, 1]} : vector<8x32xf32> to vector<8x8xf32>
    %cst_22 = arith.constant dense<0.000000e+00> : vector<8x8xf32>
    %26 = tpu.matmul %24, %25, %cst_22 {dimension_numbers = #tpu.dot_dimension_numbers<[1], [1], [0], [0], [0, 0, 1, 0], [], []>} : vector<8x8xf32>, vector<8x8xf32>, vector<8x8xf32> -> vector<8x8xf32>
    %cst_23 = arith.constant dense<0xFF800000> : vector<8xf32>
    %27 = vector.multi_reduction <maximumf>, %26, %cst_23 [1] : vector<8x8xf32> to vector<8xf32>
    %28 = vector.shape_cast %27 : vector<8xf32> to vector<8x1xf32>
    %29 = vector.broadcast %28 : vector<8x1xf32> to vector<8x8xf32>
    %30 = arith.subf %26, %29 : vector<8x8xf32>
    %31 = math.exp %30 : vector<8x8xf32>
    %cst_24 = arith.constant dense<0.000000e+00> : vector<8xf32>
    %32 = vector.multi_reduction <add>, %31, %cst_24 [1] : vector<8x8xf32> to vector<8xf32>
    %33 = vector.shape_cast %32 : vector<8xf32> to vector<8x1xf32>
    %34 = tpu.reciprocal %33 {approx = true} : vector<8x1xf32> -> vector<8x1xf32>
    %35 = vector.broadcast %34 : vector<8x1xf32> to vector<8x8xf32>
    %36 = arith.mulf %31, %35 : vector<8x8xf32>
    %37 = vector.extract_strided_slice %23 {offsets = [0, 0], sizes = [8, 8], strides = [1, 1]} : vector<8x32xf32> to vector<8x8xf32>
    %cst_25 = arith.constant dense<0.000000e+00> : vector<8x8xf32>
    %38 = tpu.matmul %36, %37, %cst_25 {dimension_numbers = #tpu.dot_dimension_numbers<[1], [0], [0], [1], [0, 0, 1, 1], [], []>} : vector<8x8xf32>, vector<8x8xf32>, vector<8x8xf32> -> vector<8x8xf32>
    %39 = vector.extract_strided_slice %21 {offsets = [0, 0], sizes = [8, 8], strides = [1, 1]} : vector<8x32xf32> to vector<8x8xf32>
    %40 = vector.extract_strided_slice %19 {offsets = [0, 0], sizes = [8, 8], strides = [1, 1]} : vector<8x32xf32> to vector<8x8xf32>
    %cst_26 = arith.constant dense<0.000000e+00> : vector<8x8xf32>
    %41 = tpu.matmul %39, %40, %cst_26 {dimension_numbers = #tpu.dot_dimension_numbers<[1], [1], [0], [0], [0, 0, 1, 0], [], []>} : vector<8x8xf32>, vector<8x8xf32>, vector<8x8xf32> -> vector<8x8xf32>
    %cst_27 = arith.constant dense<0xFF800000> : vector<8xf32>
    %42 = vector.multi_reduction <maximumf>, %41, %cst_27 [1] : vector<8x8xf32> to vector<8xf32>
    %43 = vector.shape_cast %42 : vector<8xf32> to vector<8x1xf32>
    %44 = vector.broadcast %43 : vector<8x1xf32> to vector<8x8xf32>
    %45 = arith.subf %41, %44 : vector<8x8xf32>
    %46 = math.exp %45 : vector<8x8xf32>
    %cst_28 = arith.constant dense<0.000000e+00> : vector<8xf32>
    %47 = vector.multi_reduction <add>, %46, %cst_28 [1] : vector<8x8xf32> to vector<8xf32>
    %48 = vector.shape_cast %47 : vector<8xf32> to vector<8x1xf32>
    %49 = tpu.reciprocal %48 {approx = true} : vector<8x1xf32> -> vector<8x1xf32>
    %50 = vector.broadcast %49 : vector<8x1xf32> to vector<8x8xf32>
    %51 = arith.mulf %46, %50 : vector<8x8xf32>
    %52 = vector.extract_strided_slice %20 {offsets = [0, 0], sizes = [8, 8], strides = [1, 1]} : vector<8x32xf32> to vector<8x8xf32>
    %cst_29 = arith.constant dense<0.000000e+00> : vector<8x8xf32>
    %53 = tpu.matmul %51, %52, %cst_29 {dimension_numbers = #tpu.dot_dimension_numbers<[1], [0], [0], [1], [0, 0, 1, 1], [], []>} : vector<8x8xf32>, vector<8x8xf32>, vector<8x8xf32> -> vector<8x8xf32>
    %54 = vector.extract_strided_slice %3 {offsets = [0, 0], sizes = [8, 32], strides = [1, 1]} : vector<32x32xf32> to vector<8x32xf32>
    %cst_30 = arith.constant dense<0.000000e+00> : vector<8x32xf32>
    %55 = tpu.matmul %38, %54, %cst_30 {dimension_numbers = #tpu.dot_dimension_numbers<[1], [0], [0], [1], [0, 0, 1, 1], [], []>} : vector<8x8xf32>, vector<8x32xf32>, vector<8x32xf32> -> vector<8x32xf32>
    %56 = vector.broadcast %7 : vector<1x32xf32> to vector<8x32xf32>
    %57 = arith.addf %56, %55 : vector<8x32xf32>
    %58 = vector.extract_strided_slice %2 {offsets = [0, 0], sizes = [8, 32], strides = [1, 1]} : vector<32x32xf32> to vector<8x32xf32>
    %cst_31 = arith.constant dense<0.000000e+00> : vector<8x32xf32>
    %59 = tpu.matmul %53, %58, %cst_31 {dimension_numbers = #tpu.dot_dimension_numbers<[1], [0], [0], [1], [0, 0, 1, 1], [], []>} : vector<8x8xf32>, vector<8x32xf32>, vector<8x32xf32> -> vector<8x32xf32>
    %60 = vector.broadcast %6 : vector<1x32xf32> to vector<8x32xf32>
    %61 = arith.addf %60, %59 : vector<8x32xf32>
    %62 = vector.extract_strided_slice %18 {offsets = [0, 8], sizes = [8, 8], strides = [1, 1]} : vector<8x32xf32> to vector<8x8xf32>
    %63 = vector.extract_strided_slice %22 {offsets = [0, 8], sizes = [8, 8], strides = [1, 1]} : vector<8x32xf32> to vector<8x8xf32>
    %cst_32 = arith.constant dense<0.000000e+00> : vector<8x8xf32>
    %64 = tpu.matmul %62, %63, %cst_32 {dimension_numbers = #tpu.dot_dimension_numbers<[1], [1], [0], [0], [0, 0, 1, 0], [], []>} : vector<8x8xf32>, vector<8x8xf32>, vector<8x8xf32> -> vector<8x8xf32>
    %cst_33 = arith.constant dense<0xFF800000> : vector<8xf32>
    %65 = vector.multi_reduction <maximumf>, %64, %cst_33 [1] : vector<8x8xf32> to vector<8xf32>
    %66 = vector.shape_cast %65 : vector<8xf32> to vector<8x1xf32>
    %67 = vector.broadcast %66 : vector<8x1xf32> to vector<8x8xf32>
    %68 = arith.subf %64, %67 : vector<8x8xf32>
    %69 = math.exp %68 : vector<8x8xf32>
    %cst_34 = arith.constant dense<0.000000e+00> : vector<8xf32>
    %70 = vector.multi_reduction <add>, %69, %cst_34 [1] : vector<8x8xf32> to vector<8xf32>
    %71 = vector.shape_cast %70 : vector<8xf32> to vector<8x1xf32>
    %72 = tpu.reciprocal %71 {approx = true} : vector<8x1xf32> -> vector<8x1xf32>
    %73 = vector.broadcast %72 : vector<8x1xf32> to vector<8x8xf32>
    %74 = arith.mulf %69, %73 : vector<8x8xf32>
    %75 = vector.extract_strided_slice %23 {offsets = [0, 8], sizes = [8, 8], strides = [1, 1]} : vector<8x32xf32> to vector<8x8xf32>
    %cst_35 = arith.constant dense<0.000000e+00> : vector<8x8xf32>
    %76 = tpu.matmul %74, %75, %cst_35 {dimension_numbers = #tpu.dot_dimension_numbers<[1], [0], [0], [1], [0, 0, 1, 1], [], []>} : vector<8x8xf32>, vector<8x8xf32>, vector<8x8xf32> -> vector<8x8xf32>
    %77 = vector.extract_strided_slice %21 {offsets = [0, 8], sizes = [8, 8], strides = [1, 1]} : vector<8x32xf32> to vector<8x8xf32>
    %78 = vector.extract_strided_slice %19 {offsets = [0, 8], sizes = [8, 8], strides = [1, 1]} : vector<8x32xf32> to vector<8x8xf32>
    %cst_36 = arith.constant dense<0.000000e+00> : vector<8x8xf32>
    %79 = tpu.matmul %77, %78, %cst_36 {dimension_numbers = #tpu.dot_dimension_numbers<[1], [1], [0], [0], [0, 0, 1, 0], [], []>} : vector<8x8xf32>, vector<8x8xf32>, vector<8x8xf32> -> vector<8x8xf32>
    %cst_37 = arith.constant dense<0xFF800000> : vector<8xf32>
    %80 = vector.multi_reduction <maximumf>, %79, %cst_37 [1] : vector<8x8xf32> to vector<8xf32>
    %81 = vector.shape_cast %80 : vector<8xf32> to vector<8x1xf32>
    %82 = vector.broadcast %81 : vector<8x1xf32> to vector<8x8xf32>
    %83 = arith.subf %79, %82 : vector<8x8xf32>
    %84 = math.exp %83 : vector<8x8xf32>
    %cst_38 = arith.constant dense<0.000000e+00> : vector<8xf32>
    %85 = vector.multi_reduction <add>, %84, %cst_38 [1] : vector<8x8xf32> to vector<8xf32>
    %86 = vector.shape_cast %85 : vector<8xf32> to vector<8x1xf32>
    %87 = tpu.reciprocal %86 {approx = true} : vector<8x1xf32> -> vector<8x1xf32>
    %88 = vector.broadcast %87 : vector<8x1xf32> to vector<8x8xf32>
    %89 = arith.mulf %84, %88 : vector<8x8xf32>
    %90 = vector.extract_strided_slice %20 {offsets = [0, 8], sizes = [8, 8], strides = [1, 1]} : vector<8x32xf32> to vector<8x8xf32>
    %cst_39 = arith.constant dense<0.000000e+00> : vector<8x8xf32>
    %91 = tpu.matmul %89, %90, %cst_39 {dimension_numbers = #tpu.dot_dimension_numbers<[1], [0], [0], [1], [0, 0, 1, 1], [], []>} : vector<8x8xf32>, vector<8x8xf32>, vector<8x8xf32> -> vector<8x8xf32>
    %92 = vector.extract_strided_slice %3 {offsets = [8, 0], sizes = [8, 32], strides = [1, 1]} : vector<32x32xf32> to vector<8x32xf32>
    %cst_40 = arith.constant dense<0.000000e+00> : vector<8x32xf32>
    %93 = tpu.matmul %76, %92, %cst_40 {dimension_numbers = #tpu.dot_dimension_numbers<[1], [0], [0], [1], [0, 0, 1, 1], [], []>} : vector<8x8xf32>, vector<8x32xf32>, vector<8x32xf32> -> vector<8x32xf32>
    %94 = arith.addf %57, %93 : vector<8x32xf32>
    %95 = vector.extract_strided_slice %2 {offsets = [8, 0], sizes = [8, 32], strides = [1, 1]} : vector<32x32xf32> to vector<8x32xf32>
    %cst_41 = arith.constant dense<0.000000e+00> : vector<8x32xf32>
    %96 = tpu.matmul %91, %95, %cst_41 {dimension_numbers = #tpu.dot_dimension_numbers<[1], [0], [0], [1], [0, 0, 1, 1], [], []>} : vector<8x8xf32>, vector<8x32xf32>, vector<8x32xf32> -> vector<8x32xf32>
    %97 = arith.addf %61, %96 : vector<8x32xf32>
    %98 = vector.extract_strided_slice %18 {offsets = [0, 16], sizes = [8, 8], strides = [1, 1]} : vector<8x32xf32> to vector<8x8xf32>
    %99 = vector.extract_strided_slice %22 {offsets = [0, 16], sizes = [8, 8], strides = [1, 1]} : vector<8x32xf32> to vector<8x8xf32>
    %cst_42 = arith.constant dense<0.000000e+00> : vector<8x8xf32>
    %100 = tpu.matmul %98, %99, %cst_42 {dimension_numbers = #tpu.dot_dimension_numbers<[1], [1], [0], [0], [0, 0, 1, 0], [], []>} : vector<8x8xf32>, vector<8x8xf32>, vector<8x8xf32> -> vector<8x8xf32>
    %cst_43 = arith.constant dense<0xFF800000> : vector<8xf32>
    %101 = vector.multi_reduction <maximumf>, %100, %cst_43 [1] : vector<8x8xf32> to vector<8xf32>
    %102 = vector.shape_cast %101 : vector<8xf32> to vector<8x1xf32>
    %103 = vector.broadcast %102 : vector<8x1xf32> to vector<8x8xf32>
    %104 = arith.subf %100, %103 : vector<8x8xf32>
    %105 = math.exp %104 : vector<8x8xf32>
    %cst_44 = arith.constant dense<0.000000e+00> : vector<8xf32>
    %106 = vector.multi_reduction <add>, %105, %cst_44 [1] : vector<8x8xf32> to vector<8xf32>
    %107 = vector.shape_cast %106 : vector<8xf32> to vector<8x1xf32>
    %108 = tpu.reciprocal %107 {approx = true} : vector<8x1xf32> -> vector<8x1xf32>
    %109 = vector.broadcast %108 : vector<8x1xf32> to vector<8x8xf32>
    %110 = arith.mulf %105, %109 : vector<8x8xf32>
    %111 = vector.extract_strided_slice %23 {offsets = [0, 16], sizes = [8, 8], strides = [1, 1]} : vector<8x32xf32> to vector<8x8xf32>
    %cst_45 = arith.constant dense<0.000000e+00> : vector<8x8xf32>
    %112 = tpu.matmul %110, %111, %cst_45 {dimension_numbers = #tpu.dot_dimension_numbers<[1], [0], [0], [1], [0, 0, 1, 1], [], []>} : vector<8x8xf32>, vector<8x8xf32>, vector<8x8xf32> -> vector<8x8xf32>
    %113 = vector.extract_strided_slice %21 {offsets = [0, 16], sizes = [8, 8], strides = [1, 1]} : vector<8x32xf32> to vector<8x8xf32>
    %114 = vector.extract_strided_slice %19 {offsets = [0, 16], sizes = [8, 8], strides = [1, 1]} : vector<8x32xf32> to vector<8x8xf32>
    %cst_46 = arith.constant dense<0.000000e+00> : vector<8x8xf32>
    %115 = tpu.matmul %113, %114, %cst_46 {dimension_numbers = #tpu.dot_dimension_numbers<[1], [1], [0], [0], [0, 0, 1, 0], [], []>} : vector<8x8xf32>, vector<8x8xf32>, vector<8x8xf32> -> vector<8x8xf32>
    %cst_47 = arith.constant dense<0xFF800000> : vector<8xf32>
    %116 = vector.multi_reduction <maximumf>, %115, %cst_47 [1] : vector<8x8xf32> to vector<8xf32>
    %117 = vector.shape_cast %116 : vector<8xf32> to vector<8x1xf32>
    %118 = vector.broadcast %117 : vector<8x1xf32> to vector<8x8xf32>
    %119 = arith.subf %115, %118 : vector<8x8xf32>
    %120 = math.exp %119 : vector<8x8xf32>
    %cst_48 = arith.constant dense<0.000000e+00> : vector<8xf32>
    %121 = vector.multi_reduction <add>, %120, %cst_48 [1] : vector<8x8xf32> to vector<8xf32>
    %122 = vector.shape_cast %121 : vector<8xf32> to vector<8x1xf32>
    %123 = tpu.reciprocal %122 {approx = true} : vector<8x1xf32> -> vector<8x1xf32>
    %124 = vector.broadcast %123 : vector<8x1xf32> to vector<8x8xf32>
    %125 = arith.mulf %120, %124 : vector<8x8xf32>
    %126 = vector.extract_strided_slice %20 {offsets = [0, 16], sizes = [8, 8], strides = [1, 1]} : vector<8x32xf32> to vector<8x8xf32>
    %cst_49 = arith.constant dense<0.000000e+00> : vector<8x8xf32>
    %127 = tpu.matmul %125, %126, %cst_49 {dimension_numbers = #tpu.dot_dimension_numbers<[1], [0], [0], [1], [0, 0, 1, 1], [], []>} : vector<8x8xf32>, vector<8x8xf32>, vector<8x8xf32> -> vector<8x8xf32>
    %128 = vector.extract_strided_slice %3 {offsets = [16, 0], sizes = [8, 32], strides = [1, 1]} : vector<32x32xf32> to vector<8x32xf32>
    %cst_50 = arith.constant dense<0.000000e+00> : vector<8x32xf32>
    %129 = tpu.matmul %112, %128, %cst_50 {dimension_numbers = #tpu.dot_dimension_numbers<[1], [0], [0], [1], [0, 0, 1, 1], [], []>} : vector<8x8xf32>, vector<8x32xf32>, vector<8x32xf32> -> vector<8x32xf32>
    %130 = arith.addf %94, %129 : vector<8x32xf32>
    %131 = vector.extract_strided_slice %2 {offsets = [16, 0], sizes = [8, 32], strides = [1, 1]} : vector<32x32xf32> to vector<8x32xf32>
    %cst_51 = arith.constant dense<0.000000e+00> : vector<8x32xf32>
    %132 = tpu.matmul %127, %131, %cst_51 {dimension_numbers = #tpu.dot_dimension_numbers<[1], [0], [0], [1], [0, 0, 1, 1], [], []>} : vector<8x8xf32>, vector<8x32xf32>, vector<8x32xf32> -> vector<8x32xf32>
    %133 = arith.addf %97, %132 : vector<8x32xf32>
    %134 = vector.extract_strided_slice %18 {offsets = [0, 24], sizes = [8, 8], strides = [1, 1]} : vector<8x32xf32> to vector<8x8xf32>
    %135 = vector.extract_strided_slice %22 {offsets = [0, 24], sizes = [8, 8], strides = [1, 1]} : vector<8x32xf32> to vector<8x8xf32>
    %cst_52 = arith.constant dense<0.000000e+00> : vector<8x8xf32>
    %136 = tpu.matmul %134, %135, %cst_52 {dimension_numbers = #tpu.dot_dimension_numbers<[1], [1], [0], [0], [0, 0, 1, 0], [], []>} : vector<8x8xf32>, vector<8x8xf32>, vector<8x8xf32> -> vector<8x8xf32>
    %cst_53 = arith.constant dense<0xFF800000> : vector<8xf32>
    %137 = vector.multi_reduction <maximumf>, %136, %cst_53 [1] : vector<8x8xf32> to vector<8xf32>
    %138 = vector.shape_cast %137 : vector<8xf32> to vector<8x1xf32>
    %139 = vector.broadcast %138 : vector<8x1xf32> to vector<8x8xf32>
    %140 = arith.subf %136, %139 : vector<8x8xf32>
    %141 = math.exp %140 : vector<8x8xf32>
    %cst_54 = arith.constant dense<0.000000e+00> : vector<8xf32>
    %142 = vector.multi_reduction <add>, %141, %cst_54 [1] : vector<8x8xf32> to vector<8xf32>
    %143 = vector.shape_cast %142 : vector<8xf32> to vector<8x1xf32>
    %144 = tpu.reciprocal %143 {approx = true} : vector<8x1xf32> -> vector<8x1xf32>
    %145 = vector.broadcast %144 : vector<8x1xf32> to vector<8x8xf32>
    %146 = arith.mulf %141, %145 : vector<8x8xf32>
    %147 = vector.extract_strided_slice %23 {offsets = [0, 24], sizes = [8, 8], strides = [1, 1]} : vector<8x32xf32> to vector<8x8xf32>
    %cst_55 = arith.constant dense<0.000000e+00> : vector<8x8xf32>
    %148 = tpu.matmul %146, %147, %cst_55 {dimension_numbers = #tpu.dot_dimension_numbers<[1], [0], [0], [1], [0, 0, 1, 1], [], []>} : vector<8x8xf32>, vector<8x8xf32>, vector<8x8xf32> -> vector<8x8xf32>
    %149 = vector.extract_strided_slice %21 {offsets = [0, 24], sizes = [8, 8], strides = [1, 1]} : vector<8x32xf32> to vector<8x8xf32>
    %150 = vector.extract_strided_slice %19 {offsets = [0, 24], sizes = [8, 8], strides = [1, 1]} : vector<8x32xf32> to vector<8x8xf32>
    %cst_56 = arith.constant dense<0.000000e+00> : vector<8x8xf32>
    %151 = tpu.matmul %149, %150, %cst_56 {dimension_numbers = #tpu.dot_dimension_numbers<[1], [1], [0], [0], [0, 0, 1, 0], [], []>} : vector<8x8xf32>, vector<8x8xf32>, vector<8x8xf32> -> vector<8x8xf32>
    %cst_57 = arith.constant dense<0xFF800000> : vector<8xf32>
    %152 = vector.multi_reduction <maximumf>, %151, %cst_57 [1] : vector<8x8xf32> to vector<8xf32>
    %153 = vector.shape_cast %152 : vector<8xf32> to vector<8x1xf32>
    %154 = vector.broadcast %153 : vector<8x1xf32> to vector<8x8xf32>
    %155 = arith.subf %151, %154 : vector<8x8xf32>
    %156 = math.exp %155 : vector<8x8xf32>
    %cst_58 = arith.constant dense<0.000000e+00> : vector<8xf32>
    %157 = vector.multi_reduction <add>, %156, %cst_58 [1] : vector<8x8xf32> to vector<8xf32>
    %158 = vector.shape_cast %157 : vector<8xf32> to vector<8x1xf32>
    %159 = tpu.reciprocal %158 {approx = true} : vector<8x1xf32> -> vector<8x1xf32>
    %160 = vector.broadcast %159 : vector<8x1xf32> to vector<8x8xf32>
    %161 = arith.mulf %156, %160 : vector<8x8xf32>
    %162 = vector.extract_strided_slice %20 {offsets = [0, 24], sizes = [8, 8], strides = [1, 1]} : vector<8x32xf32> to vector<8x8xf32>
    %cst_59 = arith.constant dense<0.000000e+00> : vector<8x8xf32>
    %163 = tpu.matmul %161, %162, %cst_59 {dimension_numbers = #tpu.dot_dimension_numbers<[1], [0], [0], [1], [0, 0, 1, 1], [], []>} : vector<8x8xf32>, vector<8x8xf32>, vector<8x8xf32> -> vector<8x8xf32>
    %164 = vector.extract_strided_slice %3 {offsets = [24, 0], sizes = [8, 32], strides = [1, 1]} : vector<32x32xf32> to vector<8x32xf32>
    %cst_60 = arith.constant dense<0.000000e+00> : vector<8x32xf32>
    %165 = tpu.matmul %148, %164, %cst_60 {dimension_numbers = #tpu.dot_dimension_numbers<[1], [0], [0], [1], [0, 0, 1, 1], [], []>} : vector<8x8xf32>, vector<8x32xf32>, vector<8x32xf32> -> vector<8x32xf32>
    %166 = arith.addf %130, %165 : vector<8x32xf32>
    %167 = vector.extract_strided_slice %2 {offsets = [24, 0], sizes = [8, 32], strides = [1, 1]} : vector<32x32xf32> to vector<8x32xf32>
    %cst_61 = arith.constant dense<0.000000e+00> : vector<8x32xf32>
    %168 = tpu.matmul %163, %167, %cst_61 {dimension_numbers = #tpu.dot_dimension_numbers<[1], [0], [0], [1], [0, 0, 1, 1], [], []>} : vector<8x8xf32>, vector<8x32xf32>, vector<8x32xf32> -> vector<8x32xf32>
    %169 = arith.addf %133, %168 : vector<8x32xf32>
    %c0_62 = arith.constant 0 : index
    %c0_63 = arith.constant 0 : index
    %c0_64 = arith.constant 0 : index
    %170 = vector.load %arg11[%c0_62, %c0_63, %c0_64] : memref<1x8x32xf32, #tpu.memory_space<vmem>>, vector<1x8x32xf32>
    %171 = vector.shape_cast %170 : vector<1x8x32xf32> to vector<8x32xf32>
    %172 = vector.shape_cast %169 : vector<8x32xf32> to vector<1x8x32xf32>
    tpu.vector_store %arg11[%c0_62, %c0_63, %c0_64], %172 {strides = array<i32>} : memref<1x8x32xf32, #tpu.memory_space<vmem>>, vector<1x8x32xf32>,
    %c0_65 = arith.constant 0 : index
    %c0_66 = arith.constant 0 : index
    %c0_67 = arith.constant 0 : index
    %173 = vector.load %arg12[%c0_65, %c0_66, %c0_67] : memref<1x8x32xf32, #tpu.memory_space<vmem>>, vector<1x8x32xf32>
    %174 = vector.shape_cast %173 : vector<1x8x32xf32> to vector<8x32xf32>
    %175 = vector.shape_cast %166 : vector<8x32xf32> to vector<1x8x32xf32>
    tpu.vector_store %arg12[%c0_65, %c0_66, %c0_67], %175 {strides = array<i32>} : memref<1x8x32xf32, #tpu.memory_space<vmem>>, vector<1x8x32xf32>,
    return
  }
  func.func @transform_0(%arg0: i32) -> (i32, i32, i32) {
    %c0_i32 = arith.constant 0 : i32
    %c0_i32_0 = arith.constant 0 : i32
    %c0_i32_1 = arith.constant 0 : i32
    return %arg0, %c0_i32, %c0_i32_0 : i32, i32, i32
  }
  func.func @transform_1(%arg0: i32) -> (i32, i32, i32) {
    %c0_i32 = arith.constant 0 : i32
    %c0_i32_0 = arith.constant 0 : i32
    %c0_i32_1 = arith.constant 0 : i32
    return %arg0, %c0_i32, %c0_i32_0 : i32, i32, i32
  }
  func.func @transform_2(%arg0: i32) -> (i32, i32) {
    %c0_i32 = arith.constant 0 : i32
    %c0_i32_0 = arith.constant 0 : i32
    %c0_i32_1 = arith.constant 0 : i32
    return %c0_i32, %c0_i32_0 : i32, i32
  }
  func.func @transform_3(%arg0: i32) -> (i32, i32) {
    %c0_i32 = arith.constant 0 : i32
    %c0_i32_0 = arith.constant 0 : i32
    %c0_i32_1 = arith.constant 0 : i32
    return %c0_i32, %c0_i32_0 : i32, i32
  }
  func.func @transform_4(%arg0: i32) -> (i32, i32) {
    %c0_i32 = arith.constant 0 : i32
    %c0_i32_0 = arith.constant 0 : i32
    %c0_i32_1 = arith.constant 0 : i32
    return %c0_i32, %c0_i32_0 : i32, i32
  }
  func.func @transform_5(%arg0: i32) -> (i32, i32) {
    %c0_i32 = arith.constant 0 : i32
    %c0_i32_0 = arith.constant 0 : i32
    %c0_i32_1 = arith.constant 0 : i32
    return %c0_i32, %c0_i32_0 : i32, i32
  }
  func.func @transform_6(%arg0: i32) -> (i32, i32) {
    %c0_i32 = arith.constant 0 : i32
    %c0_i32_0 = arith.constant 0 : i32
    %c0_i32_1 = arith.constant 0 : i32
    return %c0_i32, %c0_i32_0 : i32, i32
  }
  func.func @transform_7(%arg0: i32) -> (i32, i32) {
    %c0_i32 = arith.constant 0 : i32
    %c0_i32_0 = arith.constant 0 : i32
    %c0_i32_1 = arith.constant 0 : i32
    return %c0_i32, %c0_i32_0 : i32, i32
  }
  func.func @transform_8(%arg0: i32) -> (i32, i32) {
    %c0_i32 = arith.constant 0 : i32
    %c0_i32_0 = arith.constant 0 : i32
    %c0_i32_1 = arith.constant 0 : i32
    return %c0_i32, %c0_i32_0 : i32, i32
  }
  func.func @transform_9(%arg0: i32) -> (i32, i32) {
    %c0_i32 = arith.constant 0 : i32
    %c0_i32_0 = arith.constant 0 : i32
    %c0_i32_1 = arith.constant 0 : i32
    return %c0_i32, %c0_i32_0 : i32, i32
  }
  func.func @transform_10(%arg0: i32) -> (i32, i32, i32) {
    %c0_i32 = arith.constant 0 : i32
    %c0_i32_0 = arith.constant 0 : i32
    %c0_i32_1 = arith.constant 0 : i32
    return %arg0, %c0_i32, %c0_i32_0 : i32, i32, i32
  }
  func.func @transform_11(%arg0: i32) -> (i32, i32, i32) {
    %c0_i32 = arith.constant 0 : i32
    %c0_i32_0 = arith.constant 0 : i32
    %c0_i32_1 = arith.constant 0 : i32
    return %arg0, %c0_i32, %c0_i32_0 : i32, i32, i32
  }
}

</mosaic_0001>

<bundles_post_ra>
// kernel: tpu_custom_call.1
= control target key start
LH: loop header
LB: loop body
LE: loop exit
PB: predicated region body
PF: predicated region fallthrough
CT: control target
= control target key end

     0   :  { %s4176_s0 = inlined_call_operand.hbm [shape: f32[2,8,32], index: 0, kind: input, shape index: {}]   ;;  %s4177_s1 = inlined_call_operand.hbm [shape: f32[2,8,32], index: 1, kind: input, shape index: {}]   ;;  %s4178_s2 = inlined_call_operand.hbm [shape: f32[32,96], index: 2, kind: input, shape index: {}]   ;;  %s4179_s3 = inlined_call_operand.vmem [shape: f32[1,96], index: 3, kind: input, shape index: {}]   ;;  %s4180_s4 = inlined_call_operand.hbm [shape: f32[32,96], index: 4, kind: input, shape index: {}]   ;;  %s4181_s5 = inlined_call_operand.vmem [shape: f32[1,96], index: 5, kind: input, shape index: {}]   ;;  %s4182_s6 = inlined_call_operand.hbm [shape: f32[32,32], index: 6, kind: input, shape index: {}]   ;;  %s4183_s7 = inlined_call_operand.vmem [shape: f32[1,32], index: 7, kind: input, shape index: {}]   ;;  %s4184_s8 = inlined_call_operand.hbm [shape: f32[32,32], index: 8, kind: input, shape index: {}]   ;;  %s4185_s9 = inlined_call_operand.vmem [shape: f32[1,32], index: 9, kind: input, shape index: {}]   ;;  %s4186_s10 = inlined_call_operand.hbm [shape: f32[2,8,32], index: 10, kind: output, shape index: {0}]   ;;  %s4187_s11 = inlined_call_operand.hbm [shape: f32[2,8,32], index: 11, kind: output, shape index: {1}]  }
   0x1   :  { %4194 = sst [smem:[#allocation24_spill]] %s4178_s2 }
   0x2   :  { %4195 = sst [smem:[#allocation25_spill]] %s4180_s4 }
   0x3   :  { %4196 = sst [smem:[#allocation26_spill]] %s4182_s6 }
   0x4   :  { %4197 = sst [smem:[#allocation27_spill]] %s4183_s7 }
   0x5   :  { %4198 = sst [smem:[#allocation28_spill]] %s4184_s8 }
   0x6   :  { %4199 = sst [smem:[#allocation29_spill]] %s4186_s10 }
   0x7   :  { %4200 = sst [smem:[#allocation30_spill]] %s4187_s11 }
   0x8   :  { %17 = vsyncpa [#allocation3], 0 }
   0x9   :  { %19 = vsyncpa [#allocation3 + $0x1], 0 }
   0xa   :  { %20 = vsyncpa [#allocation6], 0 }
   0xb   :  { %22 = vsyncpa [#allocation6 + $0x1], 0 }
   0xc   :  { %23 = vsyncpa [#allocation9], 0 }
   0xd   :  { %24 = vsyncpa [#allocation12], 0 }
   0xe   :  { %25 = vsyncpa [#allocation4], 0 }
   0xf   :  { %27 = vsyncpa [#allocation4 + $0x1], 0 }
  0x10   :  { %28 = vsyncpa [#allocation15], 0 }
  0x11   :  { %30 = vsyncpa [#allocation15 + $0x1], 0  ;;  %s3616_s17 = smov 0   ;;  %s3618_s18 = smov 0  }
  0x12   :  { %s3620_s19 = smov 0   ;;  %s3622_s20 = smov 0  }
  0x13 LB: > { %s3532_s21 = smov [#allocation7]   ;;  %s3637_s23 = sadd.s32 4294967295, %s3530_s20   ;;  %s3530_s20 = sphi %s3622_s20, %s4233_s20   ;;  %s3526_s19 = sphi %s3620_s19, %s4232_s19   ;;  %s3522_s18 = sphi %s3618_s18, %s4231_s18   ;;  %s3518_s17 = sphi %s3616_s17, %s4230_s17  }
  0x14   : > { %s325_s22 = sshll.u32 %s3532_s21, 4  ;;  %p2810_p0 = scmp.ge.s32.totalorder %s3530_s20, 1  ;;  %s3642_s22 = int_to_ptr.vmem [resolvable:$true] %s325_s22 }
  0x15   : > { %p4190_p1 = scmp.eq.s32.totalorder %s3637_s23, 0  ;;  %p313_p2 = scmp.lt.s32.totalorder %s3530_s20, 3 }
  0x16   : > { %s3533_s25 = smov [#allocation8]   ;;  %s3534_s28 = smov [#allocation10]  }
  0x17   : > { %p3644_p3 = pnand %p2810_p0, %p313_p2  ;;  %s341_s26 = sshll.u32 %s3533_s25, 4  ;;  %s3657_s26 = int_to_ptr.vmem [resolvable:$true] %s341_s26 }
  0x18   : > { %s357_s29 = sshll.u32 %s3534_s28, 4  ;;  %s4203_s2 = sld [smem:[#allocation24_spill]]  ;;  %s3659_s29 = int_to_ptr.vmem [resolvable:$true] %s357_s29 }
  0x19   : > { %s4201_s24 = scalar_select %p3644_p3, 1, 0 }
  0x1a   : > { %p3123_p5 = pneg %p3644_p3 }
  0x1c   : > { %p3653_p6 = pnand %p3123_p5, %p4190_p1 }
  0x1e   : > { %s3244_s13 = scalar_lea.hbm %s4203_s2, 512  ;;  %p3669_p8 = pneg %p3653_p6 }
  0x1f   : > { %p3245_p7 = scmp.ne.s32.totalorder %s4203_s2, %s3244_s13  ;;  %p3251_p11 = scmp.lt.u32.totalorder %s3244_s13, %s4203_s2 }
  0x21   : > { %p3247_p9 = pnand %p3669_p8, %p3245_p7 }
  0x23   : > { %p3248_p10 = pneg %p3247_p9 }
  0x25   : > { %p3253_p12 = pnand %p3251_p11, %p3248_p10 }
  0x27   : > { %3256 = shalt.err (!%p3253_p12)
}
  0x28   : > { %s3257_s28 = scalar_lea.vmem %s3642_s22, 512  ;;  %p3265_p5 = scmp.lt.s32.totalorder %s3642_s22, %s3642_s22 }
  0x29   : > { %p3258_p13 = scmp.ne.s32.totalorder %s3642_s22, %s3257_s28  ;;  %p3266_p4 = scmp.lt.s32.totalorder %s3257_s28, %s3257_s28 }
  0x2b   : > { %p3260_p0 = pnand %p3258_p13, %p3669_p8  ;;  %p3267_p7 = por %p3266_p4, %p3265_p5 }
  0x2d   : > { %p3261_p2 = pneg %p3260_p0 }
  0x2f   : > { %p3268_p9 = pnand %p3267_p7, %p3261_p2 }
  0x31   : > { %3271 = shalt.err (!%p3268_p9)
}
  0x32   : > { %s3535_s30 = smov 128   ;;  %s3536_s12 = smov 8  }
  0x33   : > { %3126 = dma.hbm_to_vmem [thread:$0]  (!%p3653_p6), %s4203_s2, 512, %s3642_s22, [#allocation6], %s3535_s30, %s3535_s30, %s3536_s12  }
  0x34   : > { %s4205_s4 = sld [smem:[#allocation25_spill]] }
  0x3a   : > { %s3272_s25 = scalar_lea.hbm %s4205_s4, 512 }
  0x3b   : > { %p3273_p4 = scmp.ne.s32.totalorder %s4205_s4, %s3272_s25  ;;  %p3279_p12 = scmp.lt.u32.totalorder %s3272_s25, %s4205_s4 }
  0x3d   : > { %p3275_p10 = pnand %p3273_p4, %p3669_p8 }
  0x3f   : > { %p3276_p11 = pneg %p3275_p10 }
  0x41   : > { %p3281_p13 = pnand %p3279_p12, %p3276_p11 }
  0x43   : > { %3284 = shalt.err (!%p3281_p13)
}
  0x44   : > { %s3285_s22 = scalar_lea.vmem %s3657_s26, 512  ;;  %p3293_p7 = scmp.lt.s32.totalorder %s3657_s26, %s3657_s26 }
  0x45   : > { %p3286_p0 = scmp.ne.s32.totalorder %s3657_s26, %s3285_s22  ;;  %p3294_p9 = scmp.lt.s32.totalorder %s3285_s22, %s3285_s22 }
  0x47   : > { %p3288_p2 = pnand %p3286_p0, %p3669_p8  ;;  %p3295_p4 = por %p3294_p9, %p3293_p7 }
  0x49   : > { %p3289_p5 = pneg %p3288_p2 }
  0x4b   : > { %p3296_p10 = pnand %p3295_p4, %p3289_p5 }
  0x4d   : > { %3299 = shalt.err (!%p3296_p10)
}
  0x4e   : > { %3129 = dma.hbm_to_vmem [thread:$0]  (!%p3653_p6), %s4205_s4, 512, %s3657_s26, [#allocation9], %s3535_s30, %s3535_s30, %s3536_s12  }
  0x4f   : > { %s4206_s6 = sld [smem:[#allocation26_spill]] }
  0x55   : > { %s3300_s14 = scalar_lea.hbm %s4206_s6, 512 }
  0x56   : > { %p3301_p11 = scmp.ne.s32.totalorder %s4206_s6, %s3300_s14  ;;  %p3307_p0 = scmp.lt.u32.totalorder %s3300_s14, %s4206_s6 }
  0x58   : > { %p3303_p12 = pnand %p3301_p11, %p3669_p8 }
  0x5a   : > { %p3304_p13 = pneg %p3303_p12 }
  0x5c   : > { %p3309_p2 = pnand %p3307_p0, %p3304_p13 }
  0x5e   : > { %3312 = shalt.err (!%p3309_p2)
}
  0x5f   : > { %s3313_s26 = scalar_lea.vmem %s3659_s29, 512  ;;  %p3321_p4 = scmp.lt.s32.totalorder %s3659_s29, %s3659_s29 }
  0x60   : > { %p3314_p5 = scmp.ne.s32.totalorder %s3659_s29, %s3313_s26  ;;  %p3322_p10 = scmp.lt.s32.totalorder %s3313_s26, %s3313_s26 }
  0x62   : > { %p3316_p7 = pnand %p3314_p5, %p3669_p8  ;;  %p3323_p11 = por %p3322_p10, %p3321_p4 }
  0x64   : > { %p3317_p9 = pneg %p3316_p7 }
  0x66   : > { %p3324_p12 = pnand %p3323_p11, %p3317_p9 }
  0x68   : > { %3327 = shalt.err (!%p3324_p12)
}
  0x69   : > { %3132 = dma.hbm_to_vmem [thread:$0]  (!%p3653_p6), %s4206_s6, 512, %s3659_s29, [#allocation9], %s3535_s30, %s3535_s30, %s3536_s12  }
  0x6a   : > { %s3537_s10 = smov [#allocation11]   ;;  %s4207_s8 = sld [smem:[#allocation28_spill]] }
  0x6b   : > { %s373_s11 = sshll.u32 %s3537_s10, 4  ;;  %s374_s11 = int_to_ptr.vmem [resolvable:$true] %s373_s11 }
  0x70   : > { %s3328_s15 = scalar_lea.hbm %s4207_s8, 512 }
  0x71   : > { %p3329_p13 = scmp.ne.s32.totalorder %s4207_s8, %s3328_s15  ;;  %p3335_p5 = scmp.lt.u32.totalorder %s3328_s15, %s4207_s8 }
  0x73   : > { %p3331_p0 = pnand %p3329_p13, %p3669_p8 }
  0x75   : > { %p3332_p2 = pneg %p3331_p0 }
  0x77   : > { %p3337_p7 = pnand %p3335_p5, %p3332_p2 }
  0x79   : > { %3340 = shalt.err (!%p3337_p7)
}
  0x7a   : > { %s3341_s29 = scalar_lea.vmem %s374_s11, 512  ;;  %p3349_p11 = scmp.lt.s32.totalorder %s374_s11, %s374_s11 }
  0x7b   : > { %p3342_p9 = scmp.ne.s32.totalorder %s374_s11, %s3341_s29  ;;  %p3350_p12 = scmp.lt.s32.totalorder %s3341_s29, %s3341_s29 }
  0x7d   : > { %p3344_p4 = pnand %p3342_p9, %p3669_p8  ;;  %p3351_p1 = por %p3350_p12, %p3349_p11 }
  0x7f   : > { %p3345_p10 = pneg %p3344_p4 }
  0x81   : > { %p3352_p3 = pnand %p3351_p1, %p3345_p10 }
  0x83   : > { %3355 = shalt.err (!%p3352_p3)
}
  0x84   : > { %3135 = dma.hbm_to_vmem [thread:$0]  (!%p3653_p6), %s4207_s8, 512, %s374_s11, [#allocation12], %s3535_s30, %s3535_s30, %s3536_s12  }
  0x85   : > { %s2809_s27 = sadd.s32 4294967294, %s3530_s20   ;;  %s3768_s16 = sadd.s32 1, %s3530_s20  }
  0x86   : > { %s40_s10 = ssub.s32 %s3530_s20, %s3768_s16  ;;  %s43_s13 = sadd.s32 1, %s3526_s19 }
  0x87   : > { %p41_p1 = scmp.eq.s32.totalorder %s40_s10, 0  ;;  %p50_p3 = scmp.ne.s32.totalorder %s3526_s19, %s3522_s18 }
  0x88   : > { %p51_p8 = scmp.eq.s32.totalorder %s3530_s20, 0  ;;  %p56_p13 = scmp.ne.s32.totalorder %s3522_s18, %s3518_s17 }
  0x89   : > { %s3779_s14 = scalar_select %p41_p1, %s3526_s19, %s43_s13  }
  0x8a   : > { %p3781_p0 = por %p51_p8, %p50_p3  ;;  %p4210_p2 = scmp.eq.s32.totalorder %s3637_s23, 0 }
  0x8b   : > { %4208 = sst [smem:[#allocation23_spill]] %s3779_s14  ;;  %p274_p5 = scmp.eq.s32.totalorder %s3637_s23, 1 }
  0x8c   : > { %p3787_p6 = por %p4210_p2, %p56_p13  ;;  %p280_p7 = scmp.eq.s32.totalorder %s2809_s27, 1 }
  0x8d   : > { %p3154_p9 = scmp.lt.s32.totalorder %s3530_s20, 2  ;;  %s390_s12 = sand.u32 1, %s3526_s19  }
  0x8e   : > { %s4211_s30 = scalar_select %p3787_p6, 1, 0 }
  0x8f   : > { %p3794_p4 = por %p274_p5, %p50_p3  ;;  %p3798_p10 = por %p280_p7, %p56_p13 }
  0x90   : > { %s3802_s25 = sshll.u32 %s390_s12, 3  ;;  %s2817_s28 = sshll.u32 %s3530_s20, 7 }
  0x91   : > { %s4212_s11 = scalar_select %p3794_p4, 1, 0 }
  0x92   : > { %s4213_s21 = scalar_select %p3798_p10, 1, 0 }
  0x93   : > { %s3808_s22 = scalar_lea.hbm %s4176_s0, %s2817_s28  ;;  %s394_s7 = scalar_lea.vmem [#allocation2], %s3802_s25 }
  0x94   : > { %s401_s27 = sshll.u32 %s394_s7, 4  ;;  %p3815_p11 = pnand %p3154_p9, %p3781_p0  ;;  %s3811_s27 = int_to_ptr.vmem [resolvable:$true] %s401_s27 }
  0x95   : > { %s3822_s26 = scalar_lea.hbm %s4177_s1, %s2817_s28  ;;  %s408_s29 = sand.u32 1, %s3530_s20  }
  0x96   : > { %s391_s4 = scalar_lea.sflag [#allocation3], %s390_s12  ;;  %s3356_s6 = scalar_lea.hbm %s3808_s22, 128 }
  0x97   : > { %p3357_p12 = scmp.ne.s32.totalorder %s3808_s22, %s3356_s6  ;;  %p3358_p1 = pneg %p3815_p11 }
  0x98   : > { %s3361_s8 = scalar_lea.hbm %s4176_s0, 256  ;;  %p3362_p13 = scmp.lt.u32.totalorder %s3808_s22, %s4176_s0 }
  0x99   : > { %p3359_p3 = pnand %p3358_p1, %p3357_p12  ;;  %p3363_p0 = scmp.lt.u32.totalorder %s3361_s8, %s3356_s6 }
  0x9a   : > { %p3365_p5 = scmp.lt.u32.totalorder %s3356_s6, %s3808_s22 }
  0x9b   : > { %p3360_p8 = pneg %p3359_p3  ;;  %p3364_p2 = por %p3363_p0, %p3362_p13 }
  0x9d   : > { %p3366_p7 = por %p3365_p5, %p3364_p2 }
  0x9f   : > { %p3367_p9 = pnand %p3366_p7, %p3360_p8 }
  0xa1   : > { %3370 = shalt.err (!%p3367_p9)
}
  0xa2   : > { %s3371_s12 = scalar_lea.vmem %s3811_s27, 128  ;;  %s3538_s28 = smov [#allocation2]  }
  0xa3   : > { %p3372_p12 = scmp.ne.s32.totalorder %s3811_s27, %s3371_s12  ;;  %s3376_s13 = sshll.u32 %s3538_s28, 4  ;;  %s3377_s13 = int_to_ptr.vmem [resolvable:$false] %s3376_s13 }
  0xa4   : > { %s3378_s14 = scalar_lea.vmem %s3377_s13, 256  ;;  %p3379_p4 = scmp.lt.s32.totalorder %s3811_s27, %s3377_s13 }
  0xa5   : > { %p3374_p3 = pnand %p3372_p12, %p3358_p1  ;;  %p3380_p13 = scmp.lt.s32.totalorder %s3378_s14, %s3371_s12 }
  0xa7   : > { %p3375_p10 = pneg %p3374_p3  ;;  %p3381_p0 = por %p3380_p13, %p3379_p4 }
  0xa9   : > { %p3382_p2 = pnand %p3381_p0, %p3375_p10 }
  0xab   : > { %3385 = shalt.err (!%p3382_p2)
}
  0xac   : > { %3139 = dma.hbm_to_vmem [thread:$0]  (!%p3815_p11), %s3808_s22, 128, %s3811_s27, %s391_s4  }
  0xad   : > { %s412_s6 = scalar_lea.vmem [#allocation5], %s3802_s25  ;;  %s409_s15 = scalar_lea.sflag [#allocation6], %s408_s29 }
  0xae   : > { %s419_s8 = sshll.u32 %s412_s6, 4  ;;  %s3386_s7 = scalar_lea.hbm %s3822_s26, 128  ;;  %s420_s8 = int_to_ptr.vmem [resolvable:$true] %s419_s8 }
  0xaf   : > { %p3387_p4 = scmp.ne.s32.totalorder %s3822_s26, %s3386_s7  ;;  %s3391_s28 = scalar_lea.hbm %s4177_s1, 256 }
  0xb0   : > { %p3392_p5 = scmp.lt.u32.totalorder %s3822_s26, %s4177_s1  ;;  %p3393_p7 = scmp.lt.u32.totalorder %s3391_s28, %s3386_s7 }
  0xb1   : > { %p3389_p10 = pnand %p3387_p4, %p3358_p1  ;;  %p3395_p12 = scmp.lt.u32.totalorder %s3386_s7, %s3822_s26 }
  0xb2   : > { %p3394_p9 = por %p3393_p7, %p3392_p5 }
  0xb3   : > { %p3390_p8 = pneg %p3389_p10 }
  0xb4   : > { %p3396_p3 = por %p3395_p12, %p3394_p9 }
  0xb6   : > { %p3397_p13 = pnand %p3396_p3, %p3390_p8 }
  0xb8   : > { %3400 = shalt.err (!%p3397_p13)
}
  0xb9   : > { %s3401_s4 = scalar_lea.vmem %s420_s8, 128  ;;  %s3539_s25 = smov [#allocation5]  }
  0xba   : > { %p3402_p0 = scmp.ne.s32.totalorder %s420_s8, %s3401_s4  ;;  %s3406_s22 = sshll.u32 %s3539_s25, 4  ;;  %s3407_s22 = int_to_ptr.vmem [resolvable:$false] %s3406_s22 }
  0xbb   : > { %s3408_s27 = scalar_lea.vmem %s3407_s22, 256  ;;  %p3409_p10 = scmp.lt.s32.totalorder %s420_s8, %s3407_s22 }
  0xbc   : > { %p3404_p2 = pnand %p3402_p0, %p3358_p1  ;;  %p3410_p6 = scmp.lt.s32.totalorder %s3408_s27, %s3401_s4 }
  0xbe   : > { %p3405_p4 = pneg %p3404_p2  ;;  %p3411_p5 = por %p3410_p6, %p3409_p10 }
  0xc0   : > { %p3412_p7 = pnand %p3411_p5, %p3405_p4 }
  0xc2   : > { %3415 = shalt.err (!%p3412_p7)
}
  0xc3   : > { %3142 = dma.hbm_to_vmem [thread:$0]  (!%p3815_p11), %s3822_s26, 128, %s420_s8, %s409_s15  }
  0xc4   : > { %p4215_p8 = scmp.ne.s32.totalorder %s4201_s24, 0 }
  0xc5   : > { %s3875_s29 = sand.u32 (!%p4215_p8), 1, %s3522_s18   ;;  %p4216_p6 = scmp.ne.s32.totalorder (!%p4215_p8), %s4211_s30, 0 }
  0xc6   : > { %428 = sbr.rel (%p4215_p8) target bundleno = 3779 (0xec3), region = 60  ;;  %s3878_s6 = sshll.u32 (!%p4215_p8), %s3875_s29, 3 }
  0xc7   : > { %s431_s7 = scalar_lea.sflag (!%p4215_p8), [#allocation3], %s3875_s29  ;;  %s434_s2 = scalar_lea.vmem (!%p4215_p8), [#allocation2], %s3878_s6 }
  0xcd   : > { %3489 = dma.done.wait (%p4216_p6), %s431_s7, 128  }
  0xce   : > { %3491 = vsyncadd (%p4216_p6), %s431_s7, 4294967168  ;;  %s439_s24 = sand.u32 1, %s3637_s23   ;;  %s443_s26 = scalar_lea.vmem [#allocation5], %s3878_s6 }
  0xcf   : > { %s440_s10 = scalar_lea.sflag [#allocation6], %s439_s24 }
  0xd0   : > { %3493 = dma.done.wait (%p4216_p6), %s440_s10, 128  }
  0xd1   : > { %3495 = vsyncadd (%p4216_p6), %s440_s10, 4294967168  ;;  %p4217_p11 = scmp.eq.s32.totalorder %s3637_s23, 0 }
  0xd3   : > { %3497 = dma.done.wait (%p4217_p11), [#allocation6], 512   ;;  %p4218_p1 = pmov %p4217_p11 }
  0xd5   : > { %3499 = vsyncadd (%p4218_p1), [#allocation6], 4294966784  ;;  %p4219_p9 = pmov %p4218_p1 }
  0xd6   : > { %p4220_p12 = pmov %p4218_p1 }
  0xd7   : > { %3501 = dma.done.wait (%p4219_p9), [#allocation9], 1024  }
  0xd8   : > { %3503 = vsyncadd (%p4220_p12), [#allocation9], 4294966272  ;;  %p4221_p3 = pmov %p4218_p1 }
  0xd9   : > { %p4222_p13 = pmov %p4218_p1 }
  0xda   : > { %3505 = dma.done.wait (%p4221_p3), [#allocation12], 512  }
  0xdb   : > { %3507 = vsyncadd (%p4222_p13), [#allocation12], 4294966784  ;;  %v3540_v0 = vmov 0.0|0.0   ;;  %vm3541_vm0 = vmmov 0   ;;  %v3542_v1 = vmov 0.0   ;;  %v512_v2 = vld [vmem:[#allocation8] sm:$0xff] }
  0xdc   : > { %3079 = vmatprep.subr.bf16.mxu1 %v3540_v0  ;;  %3073 = vmatprep.subr.bf16.mxu0 %v3540_v0  ;;  %v513_v3 = vld [vmem:[#allocation8 + $0x8] sm:$0xff]  ;;  %v508_v4 = vld [vmem:[#allocation7] sm:$0xff]  ;;  %v514_v7 = vld [vmem:[#allocation8 + $0x10] sm:$0xff]  ;;  %vm536_vm1 = vcmask 261120   ;;  %s3543_s28 = smov 96   ;;  %vm692_vm2 = vcmask 64512  }
  0xdd   : > { %2950 = vmatprep.mubr.msk.f32.mxu1 %vm3541_vm0, %v3542_v1  ;;  %2939 = vmatprep.mubr.msk.f32.mxu0 %vm3541_vm0, %v3542_v1  ;;  %v3080_v5 = vpack.c.bf16 %v513_v3, %v512_v2  ;;  %v509_v6 = vld [vmem:[#allocation7 + $0x8] sm:$0xff]  ;;  %v515_v8 = vld [vmem:[#allocation8 + $0x18] sm:$0xff]  ;;  %v510_v10 = vld [vmem:[#allocation7 + $0x10] sm:$0xff]  ;;  %s3544_s13 = smov 64   ;;  %s3545_s14 = smov 88  }
  0xde   : > { %v3074_v9 = vpack.c.bf16 %v509_v6, %v508_v4  ;;  %v511_v11 = vld [vmem:[#allocation7 + $0x18] sm:$0xff]  ;;  %v3083_v12 = vpack.c.bf16 %v515_v8, %v514_v7  ;;  %v528_v15 = vld [vmem:[%s434_s2] sm:$0xff]  ;;  %s3546_s4 = smov 120   ;;  %s3547_s25 = smov 56  }
  0xdf   : > { %3081 = vmatpush3.bf16.msra.mxu1 %v3080_v5  ;;  %v3077_v13 = vpack.c.bf16 %v511_v11, %v510_v10  ;;  %v529_v14 = vld [vmem:[%s443_s26] sm:$0xff]  ;;  %v2831_v16 = vld [vmem:[%s4181_s5] ss:$0 sm:$0xff]  ;;  %s3548_s22 = smov 80   ;;  %s3549_s27 = smov 112  }
  0xe0   : > { %3082 = vmatprep.subr.bf16.mxu1 %v3540_v0  ;;  %3075 = vmatpush3.bf16.msra.mxu0 %v3074_v9  ;;  %v2829_v17 = vld [vmem:[%s4179_s3] ss:$0 sm:$0xff]  ;;  %s3550_s7 = smov 48   ;;  %s3551_s2 = smov 72  }
  0xe1   : > { %3076 = vmatprep.subr.bf16.mxu0 %v3540_v0  ;;  %v520_v37 = vld [vmem:[#allocation11] sm:$0xff]  ;;  %s3552_s24 = smov 104   ;;  %s3553_s10 = smov 40  }
  0xe2   : > { %v516_v56 = vld [vmem:[#allocation10] sm:$0xff]  ;;  %s2869_s8 = sshll.u32 %s3637_s23, 7  ;;  %s507_s15 = scalar_lea.vmem [#allocation14], %s3878_s6 }
  0xe3   : > { %3084 = vmatpush3.bf16.msra.mxu1 %v3083_v12  ;;  %v521_v12 = vld [vmem:[#allocation11 + $0x8] sm:$0xff]  ;;  %s2646_s12 = sshll.u32 %s507_s15, 4  ;;  %p4225_p2 = scmp.ne.s32.totalorder %s4212_s11, 0  ;;  %s4090_s12 = int_to_ptr.vmem [resolvable:$true] %s2646_s12 }
  0xe4   : > { %3078 = vmatpush3.bf16.msra.mxu0 %v3077_v13  ;;  %2958 = vmatprep.subr.mxu1 %v3542_v1  ;;  %s3554_s26 = smov [#allocation14]  }
  0xe5   : > { %2953 = vmatprep.subr.mxu0 %v3542_v1  ;;  %s3420_s30 = sshll.u32 %s3554_s26, 4  ;;  %s3421_s30 = int_to_ptr.vmem [resolvable:$false] %s3420_s30 }
  0xe6   : > { %2951 = vmatmul.mubr.msk.f32.vlgmr.msra.gmra.mrb[0].mxu1 %vm536_vm1, %v529_v14  ;;  %p3423_p5 = scmp.lt.s32.totalorder %s4090_s12, %s3421_s30 }
  0xe7   : > { %2940 = vmatmul.mubr.msk.f32.vlgmr.msra.gmra.mrb[0].mxu0 %vm536_vm1, %v528_v15  ;;  %2960 = vmatprep.mubr.msk.f32.mxu1 %vm3541_vm0, %v3542_v1 }
  0xe8   : > { %2955 = vmatprep.mubr.msk.f32.mxu0 %vm3541_vm0, %v3542_v1 }
 0x1b9   : > { %v685_v18 = vpop.f32.mrb[0].mxu1 }
 0x1ba   : > { %v3926_v19 = vadd.f32 %v2831_v16, %v685_v18  ;;  %v2952_v20 = vpop.f32.mrb[1].mxu1  ;;  %v606_v21 = vpop.f32.mrb[0].mxu0 }
 0x1bb   : > { %v3928_v22 = vadd.f32 %v2829_v17, %v606_v21  ;;  %v2941_v23 = vpop.f32.mrb[1].mxu0 }
 0x1bc   : > { %690 = vrot.lane.b32.xlu0 %v3926_v19, %s3543_s28 }
 0x1bd   : > { %855 = vrot.lane.b32.xlu1 %v3928_v22, %s3543_s28  ;;  %s3422_s28 = scalar_lea.vmem %s3421_s30, 256 }
 0x22e   : > { %v691_v24 = vpop.permute.xlu0 %690 }
 0x22f   : > { %2954 = vmatpush3.xpose.msk.msra.mxu0 %vm692_vm2, %v691_v24  ;;  %v856_v25 = vpop.permute.xlu1 %855 }
 0x230   : > { %2963 = vmatprep.subr.mxu0 %v3542_v1 }
 0x232   : > { %2956 = vmatmul.mubr.msk.f32.vlgmr.msra.gmra.mrb[2].mxu0 %vm692_vm2, %v3928_v22 }
 0x233   : > { %2964 = vmatpush3.xpose.msk.msra.mxu0 %vm692_vm2, %v856_v25  ;;  %2965 = vmatprep.mubr.msk.f32.mxu0 %vm3541_vm0, %v3542_v1 }
 0x234   : > { %2973 = vmatprep.subr.mxu0 %v3542_v1 }
 0x236   : > { %2966 = vmatmul.mubr.msk.f32.vlgmr.msra.gmra.mrb[4].mxu0 %vm692_vm2, %v3926_v19 }
 0x237   : > { %2975 = vmatprep.mubr.msk.f32.mxu0 %vm3541_vm0, %v3542_v1  ;;  %2974 = vmatpush3.msra.mxu0 %v520_v37 }
 0x238   : > { %2983 = vmatprep.subr.mxu0 %v3542_v1 }
 0x305   : > { %v764_v26 = vpop.f32.mrb[2].mxu0 }
 0x306   : > { %v2957_v27 = vpop.f32.mrb[3].mxu0  ;;  %v768_v28 = vsel %vm692_vm2, %v764_v26, -inf }
 0x307   : > { %769 = vmax.xlane.f32.xlu0 %v768_v28  ;;  %v517_v28 = vld [vmem:[#allocation10 + $0x8] sm:$0xff] }
 0x309   : > { %v927_v29 = vpop.f32.mrb[4].mxu0 }
 0x30a   : > { %v2967_v30 = vpop.f32.mrb[5].mxu0  ;;  %v931_v36 = vsel %vm692_vm2, %v927_v29, -inf }
 0x394   : > { %v770_v31 = vpop.xlane.xlu0 %769 }
 0x395   : > { %v771_v32 = vsub.f32 %v764_v26, %v770_v31 }
 0x397   : > { %v772_v33 = vmul.f32 1.442695, %v771_v32 }
 0x399   : > { %3212 = vpow2.f32 %v772_v33 }
 0x3a3   : > { %v3213_v34 = vpop.eup %3212 }
 0x3a4   : > { %v774_v35 = vsel %vm692_vm2, %v3213_v34, 0.0 }
 0x3a5   : > { %775 = vadd.xlane.f32.xlu1 %v774_v35 }
 0x3b6   : > { %779 = vrot.lane.b32.xlu1 %v3926_v19, %s3544_s13 }
 0x3ba   : > { %1180 = vrot.lane.b32.xlu1 %v3926_v19, %s3545_s14 }
 0x3be   : > { %1178 = vrot.lane.b32.xlu1 %v3928_v22, %s3546_s4 }
 0x3e2   : > { %932 = vmax.xlane.f32.xlu1 %v931_v36 }
 0x3f3   : > { %1345 = vrot.lane.b32.xlu1 %v3928_v22, %s3545_s14  ;;  %s4223_s14 = sld [smem:[#allocation30_spill]] }
 0x432   : > { %v776_v38 = vpop.xlane.xlu1 %775 }
 0x433   : > { %3214 = vrcp.f32 %v776_v38 }
 0x436   : > { %v780_v39 = vpop.permute.xlu1 %779 }
 0x437   : > { %2959 = vmatpush3.msra.mxu1 %v780_v39 }
 0x438   : > { %2968 = vmatprep.subr.mxu1 %v3542_v1 }
 0x43a   : > { %v1181_v42 = vpop.permute.xlu1 %1180 }
 0x43d   : > { %v3215_v40 = vpop.eup %3214 }
 0x43e   : > { %v778_v41 = vmul.f32 %v3215_v40, %v3213_v34  ;;  %v1179_v43 = vpop.permute.xlu1 %1178 }
 0x440   : > { %2961 = vmatmul.mubr.msk.f32.vlgmr.msra.gmra.mrb[2].mxu1 %vm692_vm2, %v778_v41 }
 0x441   : > { %2970 = vmatprep.mubr.msk.f32.mxu1 %vm3541_vm0, %v3542_v1 }
 0x46f   : > { %v933_v44 = vpop.xlane.xlu1 %932 }
 0x470   : > { %v934_v45 = vsub.f32 %v927_v29, %v933_v44 }
 0x472   : > { %v935_v46 = vmul.f32 1.442695, %v934_v45  ;;  %v522_v45 = vld [vmem:[#allocation11 + $0x10] sm:$0xff] }
 0x473   : > { %v1346_v54 = vpop.permute.xlu1 %1345 }
 0x474   : > { %3216 = vpow2.f32 %v935_v46 }
 0x47e   : > { %v3217_v47 = vpop.eup %3216 }
 0x47f   : > { %v937_v48 = vsel %vm692_vm2, %v3217_v47, 0.0 }
 0x480   : > { %938 = vadd.xlane.f32.xlu0 %v937_v48 }
 0x496   : > { %942 = vrot.lane.b32.xlu0 %v3928_v22, %s3544_s13 }
 0x50d   : > { %v939_v49 = vpop.xlane.xlu0 %938 }
 0x50e   : > { %3218 = vrcp.f32 %v939_v49 }
 0x511   : > { %v943_v50 = vpop.permute.xlu0 %942 }
 0x512   : > { %2969 = vmatpush3.msra.mxu1 %v943_v50 }
 0x513   : > { %v851_v51 = vpop.f32.mrb[2].mxu1  ;;  %2978 = vmatprep.subr.mxu1 %v3542_v1 }
 0x514   : > { %v2962_v52 = vpop.f32.mrb[3].mxu1  ;;  %2976 = vmatmul.mubr.msk.f32.vlgmr.msra.gmra.mrb[6].mxu0 %vm692_vm2, %v851_v51 }
 0x515   : > { %2984 = vmatpush3.xpose.msk.msra.mxu0 %vm692_vm2, %v1181_v42  ;;  %2985 = vmatprep.mubr.msk.f32.mxu0 %vm3541_vm0, %v3542_v1 }
 0x516   : > { %2993 = vmatprep.subr.mxu0 %v3542_v1 }
 0x518   : > { %v3219_v53 = vpop.eup %3218  ;;  %2986 = vmatmul.mubr.msk.f32.vlgmr.msra.gmra.mrb[8].mxu0 %vm692_vm2, %v1179_v43 }
 0x519   : > { %v941_v55 = vmul.f32 %v3219_v53, %v3217_v47  ;;  %2994 = vmatpush3.xpose.msk.msra.mxu0 %vm692_vm2, %v1346_v54  ;;  %2995 = vmatprep.mubr.msk.f32.mxu0 %vm3541_vm0, %v3542_v1 }
 0x51a   : > { %3003 = vmatprep.subr.mxu0 %v3542_v1 }
 0x51b   : > { %2971 = vmatmul.mubr.msk.f32.vlgmr.msra.gmra.mrb[4].mxu1 %vm692_vm2, %v941_v55 }
 0x51c   : > { %2980 = vmatprep.mubr.msk.f32.mxu1 %vm3541_vm0, %v3542_v1  ;;  %2979 = vmatpush3.msra.mxu1 %v516_v56 }
 0x51d   : > { %2988 = vmatprep.subr.mxu1 %v3542_v1 }
 0x5eb   : > { %v1252_v57 = vpop.f32.mrb[8].mxu0 }
 0x5ec   : > { %v2987_v58 = vpop.f32.mrb[9].mxu0  ;;  %v1256_v59 = vsel %vm692_vm2, %v1252_v57, -inf }
 0x5ed   : > { %1257 = vmax.xlane.f32.xlu0 %v1256_v59 }
 0x5ee   : > { %v1014_v60 = vpop.f32.mrb[4].mxu1 }
 0x5ef   : > { %v2972_v61 = vpop.f32.mrb[5].mxu1  ;;  %2981 = vmatmul.mubr.msk.f32.vlgmr.msra.gmra.mrb[6].mxu1 %vm692_vm2, %v1014_v60 }
 0x5f0   : > { %2990 = vmatprep.mubr.msk.f32.mxu1 %vm3541_vm0, %v3542_v1 }
 0x603   : > { %1343 = vrot.lane.b32.xlu0 %v3926_v19, %s3546_s4  ;;  %s4088_s4 = scalar_lea.hbm %s4223_s14, %s2869_s8 }
 0x67a   : > { %v1258_v62 = vpop.xlane.xlu0 %1257 }
 0x67b   : > { %v1259_v63 = vsub.f32 %v1252_v57, %v1258_v62 }
 0x67d   : > { %v1260_v0 = vmul.f32 1.442695, %v1259_v63 }
 0x67e   : > { %v1344_v2 = vpop.permute.xlu0 %1343 }
 0x67f   : > { %3220 = vpow2.f32 %v1260_v0  ;;  %2996 = vmatmul.mubr.msk.f32.vlgmr.msra.gmra.mrb[10].mxu0 %vm692_vm2, %v1344_v2 }
 0x680   : > { %3005 = vmatprep.mubr.msk.f32.mxu0 %vm3541_vm0, %v3542_v1  ;;  %3004 = vmatpush3.msra.mxu0 %v521_v12 }
 0x681   : > { %3013 = vmatprep.subr.mxu0 %v3542_v1 }
 0x689   : > { %v3221_v3 = vpop.eup %3220 }
 0x68a   : > { %v1262_v4 = vsel %vm692_vm2, %v3221_v3, 0.0 }
 0x68b   : > { %1263 = vadd.xlane.f32.xlu1 %v1262_v4 }
 0x69c   : > { %1267 = vrot.lane.b32.xlu1 %v3926_v19, %s3547_s25 }
 0x6a0   : > { %1658 = vrot.lane.b32.xlu1 %v3926_v19, %s3548_s22 }
 0x6a4   : > { %1656 = vrot.lane.b32.xlu1 %v3928_v22, %s3549_s27 }
 0x718   : > { %v1264_v5 = vpop.xlane.xlu1 %1263 }
 0x719   : > { %3222 = vrcp.f32 %v1264_v5 }
 0x71c   : > { %v1268_v6 = vpop.permute.xlu1 %1267 }
 0x71d   : > { %2989 = vmatpush3.msra.mxu1 %v1268_v6 }
 0x71e   : > { %2998 = vmatprep.subr.mxu1 %v3542_v1 }
 0x720   : > { %v1659_v13 = vpop.permute.xlu1 %1658 }
 0x723   : > { %v3223_v7 = vpop.eup %3222 }
 0x724   : > { %v1266_v8 = vmul.f32 %v3223_v7, %v3221_v3  ;;  %v1657_v14 = vpop.permute.xlu1 %1656 }
 0x726   : > { %2991 = vmatmul.mubr.msk.f32.vlgmr.msra.gmra.mrb[8].mxu1 %vm692_vm2, %v1266_v8 }
 0x727   : > { %3000 = vmatprep.mubr.msk.f32.mxu1 %vm3541_vm0, %v3542_v1 }
 0x752   : > { %v1417_v9 = vpop.f32.mrb[10].mxu0 }
 0x753   : > { %v2997_v10 = vpop.f32.mrb[11].mxu0  ;;  %v1421_v11 = vsel %vm692_vm2, %v1417_v9, -inf }
 0x754   : > { %1422 = vmax.xlane.f32.xlu1 %v1421_v11 }
 0x765   : > { %1432 = vrot.lane.b32.xlu1 %v3928_v22, %s3547_s25 }
 0x769   : > { %1745 = vrot.lane.b32.xlu1 %v3926_v19, %s3550_s7 }
 0x76d   : > { %1821 = vrot.lane.b32.xlu1 %v3926_v19, %s3549_s27  ;;  %s4224_s27 = sld [smem:[#allocation27_spill]] }
 0x771   : > { %2136 = vrot.lane.b32.xlu1 %v3926_v19, %s3551_s2 }
 0x775   : > { %2134 = vrot.lane.b32.xlu1 %v3928_v22, %s3552_s24 }
 0x779   : > { %2301 = vrot.lane.b32.xlu1 %v3928_v22, %s3551_s2 }
 0x7e1   : > { %v1423_v15 = vpop.xlane.xlu1 %1422 }
 0x7e2   : > { %v1424_v16 = vsub.f32 %v1417_v9, %v1423_v15 }
 0x7e4   : > { %v1425_v17 = vmul.f32 1.442695, %v1424_v16  ;;  %v518_v16 = vld [vmem:[#allocation10 + $0x10] sm:$0xff] }
 0x7e5   : > { %v1433_v18 = vpop.permute.xlu1 %1432 }
 0x7e6   : > { %3224 = vpow2.f32 %v1425_v17  ;;  %2999 = vmatpush3.msra.mxu1 %v1433_v18 }
 0x7e7   : > { %3008 = vmatprep.subr.mxu1 %v3542_v1 }
 0x7e9   : > { %v1746_v34 = vpop.permute.xlu1 %1745 }
 0x7ed   : > { %v1822_v42 = vpop.permute.xlu1 %1821 }
 0x7f0   : > { %v3225_v20 = vpop.eup %3224 }
 0x7f1   : > { %v1427_v21 = vsel %vm692_vm2, %v3225_v20, 0.0  ;;  %v2137_v46 = vpop.permute.xlu1 %2136 }
 0x7f2   : > { %1428 = vadd.xlane.f32.xlu0 %v1427_v21 }
 0x7f5   : > { %v2135_v50 = vpop.permute.xlu1 %2134 }
 0x7f9   : > { %v1339_v23 = vpop.f32.mrb[8].mxu1  ;;  %v2302_v53 = vpop.permute.xlu1 %2301 }
 0x7fa   : > { %v2992_v24 = vpop.f32.mrb[9].mxu1  ;;  %3006 = vmatmul.mubr.msk.f32.vlgmr.msra.gmra.mrb[6].mxu0 %vm692_vm2, %v1339_v23 }
 0x7fb   : > { %3014 = vmatpush3.xpose.msk.msra.mxu0 %vm692_vm2, %v1659_v13  ;;  %3015 = vmatprep.mubr.msk.f32.mxu0 %vm3541_vm0, %v3542_v1 }
 0x7fc   : > { %3023 = vmatprep.subr.mxu0 %v3542_v1 }
 0x7fe   : > { %3016 = vmatmul.mubr.msk.f32.vlgmr.msra.gmra.mrb[12].mxu0 %vm692_vm2, %v1657_v14 }
 0x7ff   : > { %3025 = vmatprep.mubr.msk.f32.mxu0 %vm3541_vm0, %v3542_v1 }
 0x87f   : > { %v1429_v25 = vpop.xlane.xlu0 %1428 }
 0x880   : > { %3226 = vrcp.f32 %v1429_v25 }
 0x88a   : > { %v3227_v26 = vpop.eup %3226 }
 0x88b   : > { %v1431_v27 = vmul.f32 %v3227_v26, %v3225_v20 }
 0x88d   : > { %3001 = vmatmul.mubr.msk.f32.vlgmr.msra.gmra.mrb[10].mxu1 %vm692_vm2, %v1431_v27 }
 0x88e   : > { %3009 = vmatpush3.msra.mxu1 %v517_v28  ;;  %3010 = vmatprep.mubr.msk.f32.mxu1 %vm3541_vm0, %v3542_v1  ;;  %v523_v28 = vld [vmem:[#allocation11 + $0x18] sm:$0xff] }
 0x88f   : > { %3018 = vmatprep.subr.mxu1 %v3542_v1 }
 0x8d1   : > { %v1730_v29 = vpop.f32.mrb[12].mxu0 }
 0x8d2   : > { %v3017_v30 = vpop.f32.mrb[13].mxu0  ;;  %v1734_v31 = vsel %vm692_vm2, %v1730_v29, -inf }
 0x8d3   : > { %1735 = vmax.xlane.f32.xlu0 %v1734_v31 }
 0x960   : > { %v1504_v32 = vpop.f32.mrb[10].mxu1  ;;  %v1736_v33 = vpop.xlane.xlu0 %1735 }
 0x961   : > { %v1737_v35 = vsub.f32 %v1730_v29, %v1736_v33  ;;  %v3002_v36 = vpop.f32.mrb[11].mxu1  ;;  %3011 = vmatmul.mubr.msk.f32.vlgmr.msra.gmra.mrb[6].mxu1 %vm692_vm2, %v1504_v32  ;;  %v519_v29 = vld [vmem:[#allocation10 + $0x18] sm:$0xff] }
 0x962   : > { %3019 = vmatpush3.msra.mxu1 %v1746_v34  ;;  %3020 = vmatprep.mubr.msk.f32.mxu1 %vm3541_vm0, %v3542_v1 }
 0x963   : > { %v1738_v37 = vmul.f32 1.442695, %v1737_v35  ;;  %3028 = vmatprep.subr.mxu1 %v3542_v1 }
 0x965   : > { %3228 = vpow2.f32 %v1738_v37  ;;  %v2842_v37 = vld [vmem:[%s4224_s27] ss:$0 sm:$0xff] }
 0x96f   : > { %v3229_v38 = vpop.eup %3228 }
 0x970   : > { %v1740_v39 = vsel %vm692_vm2, %v3229_v38, 0.0 }
 0x971   : > { %1741 = vadd.xlane.f32.xlu0 %v1740_v39 }
 0x987   : > { %1823 = vrot.lane.b32.xlu0 %v3928_v22, %s3548_s22 }
 0x98b   : > { %2299 = vrot.lane.b32.xlu0 %v3926_v19, %s3552_s24  ;;  %s2620_s24 = scalar_lea.sflag [#allocation15], %s3875_s29 }
 0x9fe   : > { %v1742_v40 = vpop.xlane.xlu0 %1741 }
 0x9ff   : > { %3230 = vrcp.f32 %v1742_v40 }
 0xa02   : > { %v1824_v41 = vpop.permute.xlu0 %1823 }
 0xa03   : > { %3024 = vmatpush3.xpose.msk.msra.mxu0 %vm692_vm2, %v1824_v41 }
 0xa04   : > { %3033 = vmatprep.subr.mxu0 %v3542_v1 }
 0xa06   : > { %3026 = vmatmul.mubr.msk.f32.vlgmr.msra.gmra.mrb[14].mxu0 %vm692_vm2, %v1822_v42  ;;  %v2300_v54 = vpop.permute.xlu0 %2299 }
 0xa07   : > { %3035 = vmatprep.mubr.msk.f32.mxu0 %vm3541_vm0, %v3542_v1  ;;  %3034 = vmatpush3.msra.mxu0 %v522_v45 }
 0xa08   : > { %3043 = vmatprep.subr.mxu0 %v3542_v1 }
 0xa09   : > { %v3231_v43 = vpop.eup %3230 }
 0xa0a   : > { %v1744_v44 = vmul.f32 %v3231_v43, %v3229_v38 }
 0xa0c   : > { %3021 = vmatmul.mubr.msk.f32.vlgmr.msra.gmra.mrb[12].mxu1 %vm692_vm2, %v1744_v44 }
 0xa0d   : > { %3030 = vmatprep.mubr.msk.f32.mxu1 %vm3541_vm0, %v3542_v1 }
 0xad9   : > { %v1895_v47 = vpop.f32.mrb[14].mxu0 }
 0xada   : > { %v3027_v48 = vpop.f32.mrb[15].mxu0  ;;  %v1899_v49 = vsel %vm692_vm2, %v1895_v47, -inf }
 0xadb   : > { %1900 = vmax.xlane.f32.xlu1 %v1899_v49 }
 0xadf   : > { %v1817_v51 = vpop.f32.mrb[12].mxu1 }
 0xae0   : > { %v3022_v52 = vpop.f32.mrb[13].mxu1  ;;  %3036 = vmatmul.mubr.msk.f32.vlgmr.msra.gmra.mrb[6].mxu0 %vm692_vm2, %v1817_v51 }
 0xae1   : > { %3044 = vmatpush3.xpose.msk.msra.mxu0 %vm692_vm2, %v2137_v46  ;;  %3045 = vmatprep.mubr.msk.f32.mxu0 %vm3541_vm0, %v3542_v1 }
 0xae2   : > { %3053 = vmatprep.subr.mxu0 %v3542_v1 }
 0xae4   : > { %3046 = vmatmul.mubr.msk.f32.vlgmr.msra.gmra.mrb[16].mxu0 %vm692_vm2, %v2135_v50 }
 0xae5   : > { %3054 = vmatpush3.xpose.msk.msra.mxu0 %vm692_vm2, %v2302_v53  ;;  %3055 = vmatprep.mubr.msk.f32.mxu0 %vm3541_vm0, %v3542_v1 }
 0xae6   : > { %3063 = vmatprep.subr.mxu0 %v3542_v1 }
 0xae8   : > { %3056 = vmatmul.mubr.msk.f32.vlgmr.msra.gmra.mrb[18].mxu0 %vm692_vm2, %v2300_v54 }
 0xae9   : > { %3065 = vmatprep.mubr.msk.f32.mxu0 %vm3541_vm0, %v3542_v1  ;;  %3064 = vmatpush3.msra.mxu0 %v523_v28 }
 0xb68   : > { %v1901_v55 = vpop.xlane.xlu1 %1900 }
 0xb69   : > { %v1902_v56 = vsub.f32 %v1895_v47, %v1901_v55 }
 0xb6b   : > { %v1903_v57 = vmul.f32 1.442695, %v1902_v56 }
 0xb6d   : > { %3232 = vpow2.f32 %v1903_v57 }
 0xb77   : > { %v3233_v58 = vpop.eup %3232 }
 0xb78   : > { %v1905_v59 = vsel %vm692_vm2, %v3233_v58, 0.0 }
 0xb79   : > { %1906 = vadd.xlane.f32.xlu0 %v1905_v59 }
 0xb8f   : > { %1910 = vrot.lane.b32.xlu0 %v3928_v22, %s3550_s7  ;;  %s500_s7 = scalar_lea.vmem [#allocation13], %s3878_s6 }
 0xb90   : > { %s4098_s2 = sshll.u32 %s500_s7, 4  ;;  %s4131_s2 = int_to_ptr.vmem [resolvable:$true] %s4098_s2 }
 0xb93   : > { %2388 = vrot.lane.b32.xlu0 %v3928_v22, %s3553_s10 }
 0xbb7   : > { %v2208_v60 = vpop.f32.mrb[16].mxu0 }
 0xbb8   : > { %v3047_v61 = vpop.f32.mrb[17].mxu0  ;;  %v2212_v62 = vsel %vm692_vm2, %v2208_v60, -inf }
 0xbb9   : > { %2213 = vmax.xlane.f32.xlu1 %v2212_v62 }
 0xbbb   : > { %v2373_v63 = vpop.f32.mrb[18].mxu0 }
 0xbbc   : > { %v3057_v0 = vpop.f32.mrb[19].mxu0  ;;  %v2377_v2 = vsel %vm692_vm2, %v2373_v63, -inf }
 0xbbd   : > { %2378 = vmax.xlane.f32.xlu1 %v2377_v2 }
 0xc06   : > { %v1907_v3 = vpop.xlane.xlu0 %1906 }
 0xc07   : > { %3234 = vrcp.f32 %v1907_v3 }
 0xc0a   : > { %v1911_v4 = vpop.permute.xlu0 %1910 }
 0xc0b   : > { %3029 = vmatpush3.msra.mxu1 %v1911_v4 }
 0xc0c   : > { %3038 = vmatprep.subr.mxu1 %v3542_v1 }
 0xc0e   : > { %v2389_v26 = vpop.permute.xlu0 %2388 }
 0xc11   : > { %v3235_v5 = vpop.eup %3234 }
 0xc12   : > { %v1909_v6 = vmul.f32 %v3235_v5, %v3233_v58 }
 0xc14   : > { %3031 = vmatmul.mubr.msk.f32.vlgmr.msra.gmra.mrb[14].mxu1 %vm692_vm2, %v1909_v6 }
 0xc15   : > { %3040 = vmatprep.mubr.msk.f32.mxu1 %vm3541_vm0, %v3542_v1  ;;  %3039 = vmatpush3.msra.mxu1 %v518_v16 }
 0xc16   : > { %3048 = vmatprep.subr.mxu1 %v3542_v1 }
 0xc46   : > { %v2214_v22 = vpop.xlane.xlu1 %2213 }
 0xc47   : > { %v2215_v7 = vsub.f32 %v2208_v60, %v2214_v22 }
 0xc49   : > { %v2216_v8 = vmul.f32 1.442695, %v2215_v7 }
 0xc4a   : > { %v2379_v9 = vpop.xlane.xlu1 %2378 }
 0xc4b   : > { %3236 = vpow2.f32 %v2216_v8  ;;  %v2380_v10 = vsub.f32 %v2373_v63, %v2379_v9 }
 0xc4d   : > { %v2381_v11 = vmul.f32 1.442695, %v2380_v10 }
 0xc4f   : > { %3238 = vpow2.f32 %v2381_v11 }
 0xc55   : > { %v3237_v12 = vpop.eup %3236 }
 0xc56   : > { %v2218_v13 = vsel %vm692_vm2, %v3237_v12, 0.0 }
 0xc57   : > { %2219 = vadd.xlane.f32.xlu1 %v2218_v13 }
 0xc59   : > { %v3239_v14 = vpop.eup %3238 }
 0xc5a   : > { %v2383_v15 = vsel %vm692_vm2, %v3239_v14, 0.0 }
 0xc5b   : > { %2384 = vadd.xlane.f32.xlu1 %v2383_v15 }
 0xc6c   : > { %2223 = vrot.lane.b32.xlu1 %v3926_v19, %s3553_s10  ;;  %s3416_s10 = scalar_lea.vmem %s4090_s12, 128 }
 0xc6d   : > { %p3417_p0 = scmp.ne.s32.totalorder %s4090_s12, %s3416_s10  ;;  %p3424_p7 = scmp.lt.s32.totalorder %s3422_s28, %s3416_s10 }
 0xc6f   : > { %p3418_p4 = pnand %p3417_p0, %p4225_p2  ;;  %p3425_p8 = por %p3424_p7, %p3423_p5 }
 0xc71   : > { %p3419_p10 = pneg %p3418_p4 }
 0xc73   : > { %p3426_p6 = pnand %p3425_p8, %p3419_p10 }
 0xce4   : > { %v2220_v17 = vpop.xlane.xlu1 %2219 }
 0xce5   : > { %3240 = vrcp.f32 %v2220_v17 }
 0xce7   : > { %v1982_v18 = vpop.f32.mrb[14].mxu1 }
 0xce8   : > { %v3032_v20 = vpop.f32.mrb[15].mxu1  ;;  %3041 = vmatmul.mubr.msk.f32.vlgmr.msra.gmra.mrb[6].mxu1 %vm692_vm2, %v1982_v18  ;;  %v2385_v21 = vpop.xlane.xlu1 %2384 }
 0xce9   : > { %3242 = vrcp.f32 %v2385_v21  ;;  %3050 = vmatprep.mubr.msk.f32.mxu1 %vm3541_vm0, %v3542_v1 }
 0xcec   : > { %v2224_v23 = vpop.permute.xlu1 %2223 }
 0xced   : > { %3049 = vmatpush3.msra.mxu1 %v2224_v23 }
 0xcee   : > { %3058 = vmatprep.subr.mxu1 %v3542_v1 }
 0xcef   : > { %v3241_v24 = vpop.eup %3240 }
 0xcf0   : > { %v2222_v25 = vmul.f32 %v3241_v24, %v3237_v12 }
 0xcf2   : > { %3051 = vmatmul.mubr.msk.f32.vlgmr.msra.gmra.mrb[16].mxu1 %vm692_vm2, %v2222_v25 }
 0xcf3   : > { %v3243_v19 = vpop.eup %3242  ;;  %3059 = vmatpush3.msra.mxu1 %v2389_v26  ;;  %3060 = vmatprep.mubr.msk.f32.mxu1 %vm3541_vm0, %v3542_v1 }
 0xcf4   : > { %v2387_v27 = vmul.f32 %v3243_v19, %v3239_v14  ;;  %3068 = vmatprep.subr.mxu1 %v3542_v1 }
 0xcf6   : > { %3061 = vmatmul.mubr.msk.f32.vlgmr.msra.gmra.mrb[18].mxu1 %vm692_vm2, %v2387_v27 }
 0xcf7   : > { %3070 = vmatprep.mubr.msk.f32.mxu1 %vm3541_vm0, %v3542_v1  ;;  %3069 = vmatpush3.msra.mxu1 %v519_v29  ;;  %v2840_v1 = vld [vmem:[%s4185_s9] ss:$0 sm:$0xff] }
 0xdc5   : > { %v2295_v30 = vpop.f32.mrb[16].mxu1 }
 0xdc6   : > { %v3052_v31 = vpop.f32.mrb[17].mxu1  ;;  %3066 = vmatmul.mubr.msk.f32.vlgmr.msra.gmra.mrb[6].mxu0 %vm692_vm2, %v2295_v30 }
 0xdc9   : > { %v2460_v32 = vpop.f32.mrb[18].mxu1 }
 0xdca   : > { %v3062_v33 = vpop.f32.mrb[19].mxu1  ;;  %3071 = vmatmul.mubr.msk.f32.vlgmr.msra.gmra.mrb[6].mxu1 %vm692_vm2, %v2460_v32 }
 0xe99   : > { %v2533_v34 = vpop.f32.mrb[6].mxu0 }
 0xe9a   : > { %v3085_v35 = vadd.f32 %v2840_v1, %v2533_v34  ;;  %v3067_v36 = vpop.f32.mrb[7].mxu0 }
 0xe9c   : > { %2613 = vst.msk [vmem:[%s507_s15] sm:$0xff] %vm536_vm1, %v3085_v35 }
 0xe9d   : > { %v2607_v38 = vpop.f32.mrb[6].mxu1 }
 0xe9e   : > { %3429 = shalt.err (!%p3426_p6)
}
 0xe9f   : > { %s3430_s15 = scalar_lea.hbm %s4088_s4, 128  ;;  %s3434_s22 = scalar_lea.hbm %s4223_s14, 256 }
 0xea0   : > { %p3431_p11 = scmp.ne.s32.totalorder %s4088_s4, %s3430_s15  ;;  %p3435_p12 = scmp.lt.u32.totalorder %s4088_s4, %s4223_s14 }
 0xea1   : > { %p3436_p3 = scmp.lt.u32.totalorder %s3434_s22, %s3430_s15  ;;  %p3438_p0 = scmp.lt.u32.totalorder %s3430_s15, %s4088_s4 }
 0xea2   : > { %p3432_p1 = pnand %p3431_p11, %p4225_p2 }
 0xea3   : > { %p3437_p13 = por %p3436_p3, %p3435_p12 }
 0xea4   : > { %p3433_p9 = pneg %p3432_p1 }
 0xea5   : > { %p3439_p4 = por %p3438_p0, %p3437_p13 }
 0xea7   : > { %p3440_p10 = pnand %p3439_p4, %p3433_p9 }
 0xea9   : > { %3443 = shalt.err (!%p3440_p10)
}
 0xeaa   : > { %3120 = dma.vmem_to_hbm [thread:$0]  (%p4225_p2), %s4090_s12, 128, %s4088_s4, %s2620_s24   ;;  %v3086_v39 = vadd.f32 %v2842_v37, %v2607_v38  ;;  %v3072_v40 = vpop.f32.mrb[7].mxu1 }
 0xeab   : > { %s4226_s28 = sld [smem:[#allocation29_spill]]  ;;  %s2615_s13 = scalar_lea.sflag [#allocation4], %s3875_s29 }
 0xeac   : > { %2612 = vst.msk [vmem:[%s500_s7] sm:$0xff] %vm536_vm1, %v3086_v39  ;;  %s3444_s25 = scalar_lea.vmem %s4131_s2, 128  ;;  %s3555_s23 = smov [#allocation13]  }
 0xead   : > { %p3445_p5 = scmp.ne.s32.totalorder %s4131_s2, %s3444_s25  ;;  %s3448_s12 = sshll.u32 %s3555_s23, 4  ;;  %s3449_s12 = int_to_ptr.vmem [resolvable:$false] %s3448_s12 }
 0xeae   : > { %s3450_s4 = scalar_lea.vmem %s3449_s12, 256  ;;  %p3451_p6 = scmp.lt.s32.totalorder %s4131_s2, %s3449_s12 }
 0xeaf   : > { %p3446_p7 = pnand %p3445_p5, %p4225_p2  ;;  %p3452_p11 = scmp.lt.s32.totalorder %s3450_s4, %s3444_s25 }
 0xeb1   : > { %s4128_s15 = scalar_lea.hbm %s4226_s28, %s2869_s8  ;;  %p3447_p8 = pneg %p3446_p7 }
 0xeb2   : > { %p3453_p1 = por %p3452_p11, %p3451_p6 }
 0xeb4   : > { %p3454_p9 = pnand %p3453_p1, %p3447_p8 }
 0xeb6   : > { %3457 = shalt.err (!%p3454_p9)
}
 0xeb7   : > { %s3458_s29 = scalar_lea.hbm %s4128_s15, 128  ;;  %s3462_s7 = scalar_lea.hbm %s4226_s28, 256 }
 0xeb8   : > { %p3459_p12 = scmp.ne.s32.totalorder %s4128_s15, %s3458_s29  ;;  %p3463_p0 = scmp.lt.u32.totalorder %s4128_s15, %s4226_s28 }
 0xeb9   : > { %p3464_p4 = scmp.lt.u32.totalorder %s3462_s7, %s3458_s29  ;;  %p3466_p5 = scmp.lt.u32.totalorder %s3458_s29, %s4128_s15 }
 0xeba   : > { %p3460_p3 = pnand %p3459_p12, %p4225_p2 }
 0xebb   : > { %p3465_p10 = por %p3464_p4, %p3463_p0 }
 0xebc   : > { %p3461_p13 = pneg %p3460_p3 }
 0xebd   : > { %p3467_p7 = por %p3466_p5, %p3465_p10 }
 0xebf   : > { %p3468_p8 = pnand %p3467_p7, %p3461_p13 }
 0xec1   : > { %3471 = shalt.err (!%p3468_p8)
}
 0xec2   : > { %3119 = dma.vmem_to_hbm [thread:$0]  (%p4225_p2), %s4131_s2, 128, %s4128_s15, %s2615_s13  }
 0xec3 PF: > { %s2658_s27 = sand.u32 1, %s3518_s17   ;;  %p4227_p6 = scmp.ne.s32.totalorder %s4213_s21, 0 }
 0xec4   : > { %p4228_p11 = scmp.ge.s32.totalorder %s3530_s20, 2  ;;  %s2659_s26 = scalar_lea.sflag [#allocation4], %s2658_s27 }
 0xec6   : > { %p3144_p1 = pnand %p4228_p11, %p4227_p6 }
 0xec8   : > { %3509 = dma.done.wait (!%p3144_p1), %s2659_s26, 128  }
 0xec9   : > { %3511 = vsyncadd (!%p3144_p1), %s2659_s26, 4294967168  ;;  %s2668_s10 = scalar_lea.sflag [#allocation15], %s2658_s27 }
 0xeca   : > { %3513 = dma.done.wait (!%p3144_p1), %s2668_s10, 128  }
 0xecb   : > { %3515 = vsyncadd (!%p3144_p1), %s2668_s10, 4294967168  ;;  %s4229_s11 = sld [smem:[#allocation23_spill]]  ;;  %p33_p2 = scmp.ge.s32.totalorder %s3768_s16, 4  }
 0xecc   : > { %s4230_s17 = smov %s3522_s18  ;;  %s4231_s18 = smov %s3526_s19 }
 0xecd   : > { %s4233_s20 = smov %s3768_s16  ;;  %35 = sbr.rel (!%p33_p2) target bundleno = 19 (0x13), region = 151 }
 0xed1   : > { %s4232_s19 = smov %s4229_s11 }
 0xed4   :  { %2673 = vsyncpa [#allocation3], 1 }
 0xed5   :  { %2675 = vsyncpa [#allocation3 + $0x1], 1 }
 0xed6   :  { %2676 = vsyncpa [#allocation6], 1 }
 0xed7   :  { %2678 = vsyncpa [#allocation6 + $0x1], 1 }
 0xed8   :  { %2679 = vsyncpa [#allocation9], 1 }
 0xed9   :  { %2680 = vsyncpa [#allocation12], 1 }
 0xeda   :  { %2681 = vsyncpa [#allocation4], 1 }
 0xedb   :  { %2683 = vsyncpa [#allocation4 + $0x1], 1 }
 0xedc   :  { %2684 = vsyncpa [#allocation15], 1 }
 0xedd   :  { %2686 = vsyncpa [#allocation15 + $0x1], 1 }

</bundles_post_ra>
